<compile_context>
chip_gen: v7x
topology: tpu7x:2x2x1
jax: 0.10.0
libtpu: 0.0.40
codegen_flags: <defaults>
</compile_context>

<pallas_src>
import functools

import jax
import jax.numpy as jnp
from jax import lax
from jax.experimental import pallas as pl
from jax.experimental.pallas import tpu as pltpu
import numpy as np

INPUT_SIZE = 9
HIDDEN_SIZE = 32
NUM_LAYERS = 2        # hard-wired: layer-0 and layer-1 cells in the kernel body
OUTPUT_SIZE = 9

I, H, O = INPUT_SIZE, HIDDEN_SIZE, OUTPUT_SIZE
G = 4 * H             # 128 gate lanes == exactly one vreg lane width

# Row offsets of each parameter section inside the packed (SLAB_ROWS, 128) slab.
ROW_WIH0 = 0           # (I, 4H)   layer-0 input weights (pre-transposed)
ROW_WHH0 = 16          # (H, 4H)   layer-0 recurrent weights
ROW_W1 = 48            # (2H, 4H)  [W_ih1; W_hh1] stacked -> single fused layer-1 dot
ROW_B0 = 112           # (1, 4H)   b_ih0 + b_hh0
ROW_B1 = 120           # (1, 4H)   b_ih1 + b_hh1
ROW_WFC = 128          # (H, 128)  fc weight; only lanes [0:O) meaningful
ROW_BFC = 160          # (1, 128)  fc bias;   only lanes [0:O) meaningful
SLAB_ROWS = 168


def _lstm_kernel(B, T, x_ref, w_ref, out_ref):
    f32 = jnp.float32

    # --- hoisted, sublane-aligned static slices of the single weight slab ---------
    wih0 = w_ref[pl.ds(ROW_WIH0, I), :]                       # (I, 4H)
    whh0 = w_ref[pl.ds(ROW_WHH0, H), :]                       # (H, 4H)
    w1 = w_ref[pl.ds(ROW_W1, 2 * H), :]                       # (2H, 4H) = [wih1; whh1]
    b0 = w_ref[pl.ds(ROW_B0, 1), :]                           # (1, 4H)
    b1 = jnp.broadcast_to(w_ref[pl.ds(ROW_B1, 1), :], (B, G))  # hoisted broadcast

    # --- layer-0 input projection for the whole sequence: one MXU matmul, entirely
    # off the recurrence critical path; kept as an SSA value (2 vregs at B=2, T=8).
    xg = jnp.dot(x_ref[...], wih0, preferred_element_type=f32) + b0   # (B*T, 4H)
    xg = xg.reshape(B, T, G)                                          # batch-major

    def gates(g, c):
        # Full-vreg transcendentals (EUP processes the whole vreg regardless of how
        # many lanes are live), then lane-slice the individual gates.
        sig = jax.nn.sigmoid(g)                                # i, f, o
        tng = jnp.tanh(g)                                      # g
        c_new = sig[:, H:2 * H] * c + sig[:, 0:H] * tng[:, 2 * H:3 * H]
        h_new = sig[:, 3 * H:4 * H] * jnp.tanh(c_new)
        return h_new, c_new

    z = jnp.zeros((B, H), f32)
    h0, c0, h1, c1 = z, z, z, z
    # Fully unrolled time loop (T is small) -> all slices are static.
    # TODO(synk): for long sequences / large batch, chunk time with
    # pltpu.emit_pipeline and add a parallel batch grid axis (v7x second TC).
    for t in range(T):
        # Layer 0: only the recurrent dot sits on the serial chain.
        g0 = xg[:, t, :] + jnp.dot(h0, whh0, preferred_element_type=f32)
        h0, c0 = gates(g0, c0)
        # Layer 1: single fused dot against the contiguous [W_ih1; W_hh1] block.
        g1 = jnp.dot(jnp.concatenate([h0, h1], axis=-1), w1,
                     preferred_element_type=f32) + b1
        h1, c1 = gates(g1, c1)

    # fc applied to the top-layer hidden state of the LAST step (== out[:, -1, :]).
    wfc = w_ref[pl.ds(ROW_WFC, H), :]                          # (H, 128)
    bfc = w_ref[pl.ds(ROW_BFC, 1), :]                          # (1, 128)
    y = jnp.dot(h1, wfc, preferred_element_type=f32) + bfc
    out_ref[...] = y[:, :O]


def motion_predictor(x, wslab):
    """x: (B, T, I) float32 (PyTorch batch_first). Returns (B, O) float32."""
    B, T, _ = x.shape
    x2 = x.reshape(B * T, I)          # contiguous batch-major flatten: free bitcast
    vmem = pltpu.MemorySpace.VMEM
    return pl.pallas_call(
        functools.partial(_lstm_kernel, B, T),
        out_shape=jax.ShapeDtypeStruct((B, O), jnp.float32),
        in_specs=[pl.BlockSpec(memory_space=vmem)] * 2,   # whole arrays in VMEM
        out_specs=pl.BlockSpec(memory_space=vmem),
    )(x2, wslab)


def init_params(key):
    """Deterministic init mimicking nn.LSTM / nn.Linear: U(-1/sqrt(H), 1/sqrt(H)).

    All weights are stored pre-transposed to (in_dim, 4H) and packed into a single
    (SLAB_ROWS, 128) f32 slab (one HBM->VMEM DMA at kernel launch).
    """
    k = 1.0 / np.sqrt(H)
    keys = jax.random.split(key, 10)
    u = lambda kk, shape: jax.random.uniform(kk, shape, jnp.float32, -k, k)

    wih0 = u(keys[0], (I, 4 * H))
    whh0 = u(keys[1], (H, 4 * H))
    b0 = u(keys[2], (1, 4 * H)) + u(keys[3], (1, 4 * H))     # b_ih0 + b_hh0
    wih1 = u(keys[4], (H, 4 * H))
    whh1 = u(keys[5], (H, 4 * H))
    b1 = u(keys[6], (1, 4 * H)) + u(keys[7], (1, 4 * H))     # b_ih1 + b_hh1
    wfc = u(keys[8], (H, O))
    bfc = u(keys[9], (1, O))

    slab = jnp.zeros((SLAB_ROWS, G), jnp.float32)
    slab = slab.at[ROW_WIH0:ROW_WIH0 + I].set(wih0)
    slab = slab.at[ROW_WHH0:ROW_WHH0 + H].set(whh0)
    slab = slab.at[ROW_W1:ROW_W1 + H].set(wih1)
    slab = slab.at[ROW_W1 + H:ROW_W1 + 2 * H].set(whh1)
    slab = slab.at[ROW_B0].set(b0[0])
    slab = slab.at[ROW_B1].set(b1[0])
    slab = slab.at[ROW_WFC:ROW_WFC + H, :O].set(wfc)
    slab = slab.at[ROW_BFC, :O].set(bfc[0])
    return slab


def reference(x, wslab):
    """Pure-JAX reference of the same forward pass (for correctness check)."""
    wih0 = wslab[ROW_WIH0:ROW_WIH0 + I]
    whh0 = wslab[ROW_WHH0:ROW_WHH0 + H]
    wih1 = wslab[ROW_W1:ROW_W1 + H]
    whh1 = wslab[ROW_W1 + H:ROW_W1 + 2 * H]
    b0 = wslab[ROW_B0:ROW_B0 + 1]
    b1 = wslab[ROW_B1:ROW_B1 + 1]
    wfc = wslab[ROW_WFC:ROW_WFC + H, :O]
    bfc = wslab[ROW_BFC:ROW_BFC + 1, :O]
    B = x.shape[0]

    def cell(x_in, h, c, wih, whh, b):
        g = x_in @ wih + h @ whh + b
        i_g = jax.nn.sigmoid(g[:, :H])
        f_g = jax.nn.sigmoid(g[:, H:2 * H])
        g_g = jnp.tanh(g[:, 2 * H:3 * H])
        o_g = jax.nn.sigmoid(g[:, 3 * H:])
        c = f_g * c + i_g * g_g
        h = o_g * jnp.tanh(c)
        return h, c

    def step(carry, x_t):
        h0, c0, h1, c1 = carry
        h0, c0 = cell(x_t, h0, c0, wih0, whh0, b0)
        h1, c1 = cell(h0, h1, c1, wih1, whh1, b1)
        return (h0, c0, h1, c1), None

    init = tuple(jnp.zeros((B, H), jnp.float32) for _ in range(4))
    (_, _, h1, _), _ = lax.scan(step, init, jnp.transpose(x, (1, 0, 2)))
    return h1 @ wfc + bfc


if __name__ == "__main__":
    B, T = 2, 8
    x = jax.random.normal(jax.random.PRNGKey(0), (B, T, I), dtype=jnp.float32)
    wslab = init_params(jax.random.PRNGKey(42))

    out = jax.block_until_ready(motion_predictor(x, wslab))
    ref = jax.block_until_ready(reference(x, wslab))
    np.testing.assert_allclose(np.asarray(out), np.asarray(ref), atol=1e-4, rtol=1e-4)

    print("KERNEL_OK")
</pallas_src>

<mosaic_0001>
module attributes {stable_mosaic.version = 11 : i64} {
  func.func @_lstm_kernel(%arg0: memref<16x9xf32, #tpu.memory_space<vmem>>, %arg1: memref<168x128xf32, #tpu.memory_space<vmem>>, %arg2: memref<2x9xf32, #tpu.memory_space<vmem>>) attributes {dimension_semantics = [], scalar_prefetch = 0 : i64, scratch_operands = 0 : i64, tpu.core_type = #tpu.core_type<tc>} {
    %c0 = arith.constant 0 : index
    %c0_0 = arith.constant 0 : index
    %0 = vector.load %arg1[%c0, %c0_0] : memref<168x128xf32, #tpu.memory_space<vmem>>, vector<9x128xf32>
    %c16 = arith.constant 16 : index
    %c0_1 = arith.constant 0 : index
    %1 = vector.load %arg1[%c16, %c0_1] : memref<168x128xf32, #tpu.memory_space<vmem>>, vector<32x128xf32>
    %c48 = arith.constant 48 : index
    %c0_2 = arith.constant 0 : index
    %2 = vector.load %arg1[%c48, %c0_2] : memref<168x128xf32, #tpu.memory_space<vmem>>, vector<64x128xf32>
    %c112 = arith.constant 112 : index
    %c0_3 = arith.constant 0 : index
    %3 = vector.load %arg1[%c112, %c0_3] : memref<168x128xf32, #tpu.memory_space<vmem>>, vector<1x128xf32>
    %c120 = arith.constant 120 : index
    %c0_4 = arith.constant 0 : index
    %4 = vector.load %arg1[%c120, %c0_4] : memref<168x128xf32, #tpu.memory_space<vmem>>, vector<1x128xf32>
    %5 = vector.shape_cast %4 : vector<1x128xf32> to vector<1x128xf32>
    %6 = vector.broadcast %5 : vector<1x128xf32> to vector<2x128xf32>
    %c0_5 = arith.constant 0 : index
    %c0_6 = arith.constant 0 : index
    %7 = vector.load %arg0[%c0_5, %c0_6] : memref<16x9xf32, #tpu.memory_space<vmem>>, vector<16x9xf32>
    %cst = arith.constant dense<0.000000e+00> : vector<16x128xf32>
    %8 = tpu.matmul %7, %0, %cst {dimension_numbers = #tpu.dot_dimension_numbers<[1], [0], [0], [1], [0, 0, 1, 1], [], []>} : vector<16x9xf32>, vector<9x128xf32>, vector<16x128xf32> -> vector<16x128xf32>
    %9 = vector.broadcast %3 : vector<1x128xf32> to vector<16x128xf32>
    %10 = arith.addf %8, %9 : vector<16x128xf32>
    %11 = vector.shape_cast %10 : vector<16x128xf32> to vector<2x8x128xf32>
    %cst_7 = arith.constant 0.000000e+00 : f32
    %12 = vector.broadcast %cst_7 : f32 to vector<2x32xf32>
    %13 = vector.extract_strided_slice %11 {offsets = [0, 0, 0], sizes = [2, 1, 128], strides = [1, 1, 1]} : vector<2x8x128xf32> to vector<2x1x128xf32>
    %14 = vector.shape_cast %13 : vector<2x1x128xf32> to vector<2x128xf32>
    %cst_8 = arith.constant dense<0.000000e+00> : vector<2x128xf32>
    %15 = tpu.matmul %12, %1, %cst_8 {dimension_numbers = #tpu.dot_dimension_numbers<[1], [0], [0], [1], [0, 0, 1, 1], [], []>} : vector<2x32xf32>, vector<32x128xf32>, vector<2x128xf32> -> vector<2x128xf32>
    %16 = arith.addf %14, %15 : vector<2x128xf32>
    %17 = arith.negf %16 : vector<2x128xf32>
    %18 = math.exp %17 : vector<2x128xf32>
    %cst_9 = arith.constant 1.000000e+00 : f32
    %19 = vector.broadcast %cst_9 : f32 to vector<2x128xf32>
    %20 = arith.addf %19, %18 : vector<2x128xf32>
    %21 = arith.divf %19, %20 : vector<2x128xf32>
    %22 = math.tanh %16 : vector<2x128xf32>
    %23 = vector.extract_strided_slice %21 {offsets = [0, 32], sizes = [2, 32], strides = [1, 1]} : vector<2x128xf32> to vector<2x32xf32>
    %24 = arith.mulf %23, %12 : vector<2x32xf32>
    %25 = vector.extract_strided_slice %21 {offsets = [0, 0], sizes = [2, 32], strides = [1, 1]} : vector<2x128xf32> to vector<2x32xf32>
    %26 = vector.extract_strided_slice %22 {offsets = [0, 64], sizes = [2, 32], strides = [1, 1]} : vector<2x128xf32> to vector<2x32xf32>
    %27 = arith.mulf %25, %26 : vector<2x32xf32>
    %28 = arith.addf %24, %27 : vector<2x32xf32>
    %29 = vector.extract_strided_slice %21 {offsets = [0, 96], sizes = [2, 32], strides = [1, 1]} : vector<2x128xf32> to vector<2x32xf32>
    %30 = math.tanh %28 : vector<2x32xf32>
    %31 = arith.mulf %29, %30 : vector<2x32xf32>
    %32 = tpu.concatenate %31, %12 in 1 : vector<2x32xf32>, vector<2x32xf32> -> vector<2x64xf32>
    %cst_10 = arith.constant dense<0.000000e+00> : vector<2x128xf32>
    %33 = tpu.matmul %32, %2, %cst_10 {dimension_numbers = #tpu.dot_dimension_numbers<[1], [0], [0], [1], [0, 0, 1, 1], [], []>} : vector<2x64xf32>, vector<64x128xf32>, vector<2x128xf32> -> vector<2x128xf32>
    %34 = arith.addf %33, %6 : vector<2x128xf32>
    %35 = arith.negf %34 : vector<2x128xf32>
    %36 = math.exp %35 : vector<2x128xf32>
    %cst_11 = arith.constant 1.000000e+00 : f32
    %37 = vector.broadcast %cst_11 : f32 to vector<2x128xf32>
    %38 = arith.addf %37, %36 : vector<2x128xf32>
    %39 = arith.divf %37, %38 : vector<2x128xf32>
    %40 = math.tanh %34 : vector<2x128xf32>
    %41 = vector.extract_strided_slice %39 {offsets = [0, 32], sizes = [2, 32], strides = [1, 1]} : vector<2x128xf32> to vector<2x32xf32>
    %42 = arith.mulf %41, %12 : vector<2x32xf32>
    %43 = vector.extract_strided_slice %39 {offsets = [0, 0], sizes = [2, 32], strides = [1, 1]} : vector<2x128xf32> to vector<2x32xf32>
    %44 = vector.extract_strided_slice %40 {offsets = [0, 64], sizes = [2, 32], strides = [1, 1]} : vector<2x128xf32> to vector<2x32xf32>
    %45 = arith.mulf %43, %44 : vector<2x32xf32>
    %46 = arith.addf %42, %45 : vector<2x32xf32>
    %47 = vector.extract_strided_slice %39 {offsets = [0, 96], sizes = [2, 32], strides = [1, 1]} : vector<2x128xf32> to vector<2x32xf32>
    %48 = math.tanh %46 : vector<2x32xf32>
    %49 = arith.mulf %47, %48 : vector<2x32xf32>
    %50 = vector.extract_strided_slice %11 {offsets = [0, 1, 0], sizes = [2, 1, 128], strides = [1, 1, 1]} : vector<2x8x128xf32> to vector<2x1x128xf32>
    %51 = vector.shape_cast %50 : vector<2x1x128xf32> to vector<2x128xf32>
    %cst_12 = arith.constant dense<0.000000e+00> : vector<2x128xf32>
    %52 = tpu.matmul %31, %1, %cst_12 {dimension_numbers = #tpu.dot_dimension_numbers<[1], [0], [0], [1], [0, 0, 1, 1], [], []>} : vector<2x32xf32>, vector<32x128xf32>, vector<2x128xf32> -> vector<2x128xf32>
    %53 = arith.addf %51, %52 : vector<2x128xf32>
    %54 = arith.negf %53 : vector<2x128xf32>
    %55 = math.exp %54 : vector<2x128xf32>
    %cst_13 = arith.constant 1.000000e+00 : f32
    %56 = vector.broadcast %cst_13 : f32 to vector<2x128xf32>
    %57 = arith.addf %56, %55 : vector<2x128xf32>
    %58 = arith.divf %56, %57 : vector<2x128xf32>
    %59 = math.tanh %53 : vector<2x128xf32>
    %60 = vector.extract_strided_slice %58 {offsets = [0, 32], sizes = [2, 32], strides = [1, 1]} : vector<2x128xf32> to vector<2x32xf32>
    %61 = arith.mulf %60, %28 : vector<2x32xf32>
    %62 = vector.extract_strided_slice %58 {offsets = [0, 0], sizes = [2, 32], strides = [1, 1]} : vector<2x128xf32> to vector<2x32xf32>
    %63 = vector.extract_strided_slice %59 {offsets = [0, 64], sizes = [2, 32], strides = [1, 1]} : vector<2x128xf32> to vector<2x32xf32>
    %64 = arith.mulf %62, %63 : vector<2x32xf32>
    %65 = arith.addf %61, %64 : vector<2x32xf32>
    %66 = vector.extract_strided_slice %58 {offsets = [0, 96], sizes = [2, 32], strides = [1, 1]} : vector<2x128xf32> to vector<2x32xf32>
    %67 = math.tanh %65 : vector<2x32xf32>
    %68 = arith.mulf %66, %67 : vector<2x32xf32>
    %69 = tpu.concatenate %68, %49 in 1 : vector<2x32xf32>, vector<2x32xf32> -> vector<2x64xf32>
    %cst_14 = arith.constant dense<0.000000e+00> : vector<2x128xf32>
    %70 = tpu.matmul %69, %2, %cst_14 {dimension_numbers = #tpu.dot_dimension_numbers<[1], [0], [0], [1], [0, 0, 1, 1], [], []>} : vector<2x64xf32>, vector<64x128xf32>, vector<2x128xf32> -> vector<2x128xf32>
    %71 = arith.addf %70, %6 : vector<2x128xf32>
    %72 = arith.negf %71 : vector<2x128xf32>
    %73 = math.exp %72 : vector<2x128xf32>
    %cst_15 = arith.constant 1.000000e+00 : f32
    %74 = vector.broadcast %cst_15 : f32 to vector<2x128xf32>
    %75 = arith.addf %74, %73 : vector<2x128xf32>
    %76 = arith.divf %74, %75 : vector<2x128xf32>
    %77 = math.tanh %71 : vector<2x128xf32>
    %78 = vector.extract_strided_slice %76 {offsets = [0, 32], sizes = [2, 32], strides = [1, 1]} : vector<2x128xf32> to vector<2x32xf32>
    %79 = arith.mulf %78, %46 : vector<2x32xf32>
    %80 = vector.extract_strided_slice %76 {offsets = [0, 0], sizes = [2, 32], strides = [1, 1]} : vector<2x128xf32> to vector<2x32xf32>
    %81 = vector.extract_strided_slice %77 {offsets = [0, 64], sizes = [2, 32], strides = [1, 1]} : vector<2x128xf32> to vector<2x32xf32>
    %82 = arith.mulf %80, %81 : vector<2x32xf32>
    %83 = arith.addf %79, %82 : vector<2x32xf32>
    %84 = vector.extract_strided_slice %76 {offsets = [0, 96], sizes = [2, 32], strides = [1, 1]} : vector<2x128xf32> to vector<2x32xf32>
    %85 = math.tanh %83 : vector<2x32xf32>
    %86 = arith.mulf %84, %85 : vector<2x32xf32>
    %87 = vector.extract_strided_slice %11 {offsets = [0, 2, 0], sizes = [2, 1, 128], strides = [1, 1, 1]} : vector<2x8x128xf32> to vector<2x1x128xf32>
    %88 = vector.shape_cast %87 : vector<2x1x128xf32> to vector<2x128xf32>
    %cst_16 = arith.constant dense<0.000000e+00> : vector<2x128xf32>
    %89 = tpu.matmul %68, %1, %cst_16 {dimension_numbers = #tpu.dot_dimension_numbers<[1], [0], [0], [1], [0, 0, 1, 1], [], []>} : vector<2x32xf32>, vector<32x128xf32>, vector<2x128xf32> -> vector<2x128xf32>
    %90 = arith.addf %88, %89 : vector<2x128xf32>
    %91 = arith.negf %90 : vector<2x128xf32>
    %92 = math.exp %91 : vector<2x128xf32>
    %cst_17 = arith.constant 1.000000e+00 : f32
    %93 = vector.broadcast %cst_17 : f32 to vector<2x128xf32>
    %94 = arith.addf %93, %92 : vector<2x128xf32>
    %95 = arith.divf %93, %94 : vector<2x128xf32>
    %96 = math.tanh %90 : vector<2x128xf32>
    %97 = vector.extract_strided_slice %95 {offsets = [0, 32], sizes = [2, 32], strides = [1, 1]} : vector<2x128xf32> to vector<2x32xf32>
    %98 = arith.mulf %97, %65 : vector<2x32xf32>
    %99 = vector.extract_strided_slice %95 {offsets = [0, 0], sizes = [2, 32], strides = [1, 1]} : vector<2x128xf32> to vector<2x32xf32>
    %100 = vector.extract_strided_slice %96 {offsets = [0, 64], sizes = [2, 32], strides = [1, 1]} : vector<2x128xf32> to vector<2x32xf32>
    %101 = arith.mulf %99, %100 : vector<2x32xf32>
    %102 = arith.addf %98, %101 : vector<2x32xf32>
    %103 = vector.extract_strided_slice %95 {offsets = [0, 96], sizes = [2, 32], strides = [1, 1]} : vector<2x128xf32> to vector<2x32xf32>
    %104 = math.tanh %102 : vector<2x32xf32>
    %105 = arith.mulf %103, %104 : vector<2x32xf32>
    %106 = tpu.concatenate %105, %86 in 1 : vector<2x32xf32>, vector<2x32xf32> -> vector<2x64xf32>
    %cst_18 = arith.constant dense<0.000000e+00> : vector<2x128xf32>
    %107 = tpu.matmul %106, %2, %cst_18 {dimension_numbers = #tpu.dot_dimension_numbers<[1], [0], [0], [1], [0, 0, 1, 1], [], []>} : vector<2x64xf32>, vector<64x128xf32>, vector<2x128xf32> -> vector<2x128xf32>
    %108 = arith.addf %107, %6 : vector<2x128xf32>
    %109 = arith.negf %108 : vector<2x128xf32>
    %110 = math.exp %109 : vector<2x128xf32>
    %cst_19 = arith.constant 1.000000e+00 : f32
    %111 = vector.broadcast %cst_19 : f32 to vector<2x128xf32>
    %112 = arith.addf %111, %110 : vector<2x128xf32>
    %113 = arith.divf %111, %112 : vector<2x128xf32>
    %114 = math.tanh %108 : vector<2x128xf32>
    %115 = vector.extract_strided_slice %113 {offsets = [0, 32], sizes = [2, 32], strides = [1, 1]} : vector<2x128xf32> to vector<2x32xf32>
    %116 = arith.mulf %115, %83 : vector<2x32xf32>
    %117 = vector.extract_strided_slice %113 {offsets = [0, 0], sizes = [2, 32], strides = [1, 1]} : vector<2x128xf32> to vector<2x32xf32>
    %118 = vector.extract_strided_slice %114 {offsets = [0, 64], sizes = [2, 32], strides = [1, 1]} : vector<2x128xf32> to vector<2x32xf32>
    %119 = arith.mulf %117, %118 : vector<2x32xf32>
    %120 = arith.addf %116, %119 : vector<2x32xf32>
    %121 = vector.extract_strided_slice %113 {offsets = [0, 96], sizes = [2, 32], strides = [1, 1]} : vector<2x128xf32> to vector<2x32xf32>
    %122 = math.tanh %120 : vector<2x32xf32>
    %123 = arith.mulf %121, %122 : vector<2x32xf32>
    %124 = vector.extract_strided_slice %11 {offsets = [0, 3, 0], sizes = [2, 1, 128], strides = [1, 1, 1]} : vector<2x8x128xf32> to vector<2x1x128xf32>
    %125 = vector.shape_cast %124 : vector<2x1x128xf32> to vector<2x128xf32>
    %cst_20 = arith.constant dense<0.000000e+00> : vector<2x128xf32>
    %126 = tpu.matmul %105, %1, %cst_20 {dimension_numbers = #tpu.dot_dimension_numbers<[1], [0], [0], [1], [0, 0, 1, 1], [], []>} : vector<2x32xf32>, vector<32x128xf32>, vector<2x128xf32> -> vector<2x128xf32>
    %127 = arith.addf %125, %126 : vector<2x128xf32>
    %128 = arith.negf %127 : vector<2x128xf32>
    %129 = math.exp %128 : vector<2x128xf32>
    %cst_21 = arith.constant 1.000000e+00 : f32
    %130 = vector.broadcast %cst_21 : f32 to vector<2x128xf32>
    %131 = arith.addf %130, %129 : vector<2x128xf32>
    %132 = arith.divf %130, %131 : vector<2x128xf32>
    %133 = math.tanh %127 : vector<2x128xf32>
    %134 = vector.extract_strided_slice %132 {offsets = [0, 32], sizes = [2, 32], strides = [1, 1]} : vector<2x128xf32> to vector<2x32xf32>
    %135 = arith.mulf %134, %102 : vector<2x32xf32>
    %136 = vector.extract_strided_slice %132 {offsets = [0, 0], sizes = [2, 32], strides = [1, 1]} : vector<2x128xf32> to vector<2x32xf32>
    %137 = vector.extract_strided_slice %133 {offsets = [0, 64], sizes = [2, 32], strides = [1, 1]} : vector<2x128xf32> to vector<2x32xf32>
    %138 = arith.mulf %136, %137 : vector<2x32xf32>
    %139 = arith.addf %135, %138 : vector<2x32xf32>
    %140 = vector.extract_strided_slice %132 {offsets = [0, 96], sizes = [2, 32], strides = [1, 1]} : vector<2x128xf32> to vector<2x32xf32>
    %141 = math.tanh %139 : vector<2x32xf32>
    %142 = arith.mulf %140, %141 : vector<2x32xf32>
    %143 = tpu.concatenate %142, %123 in 1 : vector<2x32xf32>, vector<2x32xf32> -> vector<2x64xf32>
    %cst_22 = arith.constant dense<0.000000e+00> : vector<2x128xf32>
    %144 = tpu.matmul %143, %2, %cst_22 {dimension_numbers = #tpu.dot_dimension_numbers<[1], [0], [0], [1], [0, 0, 1, 1], [], []>} : vector<2x64xf32>, vector<64x128xf32>, vector<2x128xf32> -> vector<2x128xf32>
    %145 = arith.addf %144, %6 : vector<2x128xf32>
    %146 = arith.negf %145 : vector<2x128xf32>
    %147 = math.exp %146 : vector<2x128xf32>
    %cst_23 = arith.constant 1.000000e+00 : f32
    %148 = vector.broadcast %cst_23 : f32 to vector<2x128xf32>
    %149 = arith.addf %148, %147 : vector<2x128xf32>
    %150 = arith.divf %148, %149 : vector<2x128xf32>
    %151 = math.tanh %145 : vector<2x128xf32>
    %152 = vector.extract_strided_slice %150 {offsets = [0, 32], sizes = [2, 32], strides = [1, 1]} : vector<2x128xf32> to vector<2x32xf32>
    %153 = arith.mulf %152, %120 : vector<2x32xf32>
    %154 = vector.extract_strided_slice %150 {offsets = [0, 0], sizes = [2, 32], strides = [1, 1]} : vector<2x128xf32> to vector<2x32xf32>
    %155 = vector.extract_strided_slice %151 {offsets = [0, 64], sizes = [2, 32], strides = [1, 1]} : vector<2x128xf32> to vector<2x32xf32>
    %156 = arith.mulf %154, %155 : vector<2x32xf32>
    %157 = arith.addf %153, %156 : vector<2x32xf32>
    %158 = vector.extract_strided_slice %150 {offsets = [0, 96], sizes = [2, 32], strides = [1, 1]} : vector<2x128xf32> to vector<2x32xf32>
    %159 = math.tanh %157 : vector<2x32xf32>
    %160 = arith.mulf %158, %159 : vector<2x32xf32>
    %161 = vector.extract_strided_slice %11 {offsets = [0, 4, 0], sizes = [2, 1, 128], strides = [1, 1, 1]} : vector<2x8x128xf32> to vector<2x1x128xf32>
    %162 = vector.shape_cast %161 : vector<2x1x128xf32> to vector<2x128xf32>
    %cst_24 = arith.constant dense<0.000000e+00> : vector<2x128xf32>
    %163 = tpu.matmul %142, %1, %cst_24 {dimension_numbers = #tpu.dot_dimension_numbers<[1], [0], [0], [1], [0, 0, 1, 1], [], []>} : vector<2x32xf32>, vector<32x128xf32>, vector<2x128xf32> -> vector<2x128xf32>
    %164 = arith.addf %162, %163 : vector<2x128xf32>
    %165 = arith.negf %164 : vector<2x128xf32>
    %166 = math.exp %165 : vector<2x128xf32>
    %cst_25 = arith.constant 1.000000e+00 : f32
    %167 = vector.broadcast %cst_25 : f32 to vector<2x128xf32>
    %168 = arith.addf %167, %166 : vector<2x128xf32>
    %169 = arith.divf %167, %168 : vector<2x128xf32>
    %170 = math.tanh %164 : vector<2x128xf32>
    %171 = vector.extract_strided_slice %169 {offsets = [0, 32], sizes = [2, 32], strides = [1, 1]} : vector<2x128xf32> to vector<2x32xf32>
    %172 = arith.mulf %171, %139 : vector<2x32xf32>
    %173 = vector.extract_strided_slice %169 {offsets = [0, 0], sizes = [2, 32], strides = [1, 1]} : vector<2x128xf32> to vector<2x32xf32>
    %174 = vector.extract_strided_slice %170 {offsets = [0, 64], sizes = [2, 32], strides = [1, 1]} : vector<2x128xf32> to vector<2x32xf32>
    %175 = arith.mulf %173, %174 : vector<2x32xf32>
    %176 = arith.addf %172, %175 : vector<2x32xf32>
    %177 = vector.extract_strided_slice %169 {offsets = [0, 96], sizes = [2, 32], strides = [1, 1]} : vector<2x128xf32> to vector<2x32xf32>
    %178 = math.tanh %176 : vector<2x32xf32>
    %179 = arith.mulf %177, %178 : vector<2x32xf32>
    %180 = tpu.concatenate %179, %160 in 1 : vector<2x32xf32>, vector<2x32xf32> -> vector<2x64xf32>
    %cst_26 = arith.constant dense<0.000000e+00> : vector<2x128xf32>
    %181 = tpu.matmul %180, %2, %cst_26 {dimension_numbers = #tpu.dot_dimension_numbers<[1], [0], [0], [1], [0, 0, 1, 1], [], []>} : vector<2x64xf32>, vector<64x128xf32>, vector<2x128xf32> -> vector<2x128xf32>
    %182 = arith.addf %181, %6 : vector<2x128xf32>
    %183 = arith.negf %182 : vector<2x128xf32>
    %184 = math.exp %183 : vector<2x128xf32>
    %cst_27 = arith.constant 1.000000e+00 : f32
    %185 = vector.broadcast %cst_27 : f32 to vector<2x128xf32>
    %186 = arith.addf %185, %184 : vector<2x128xf32>
    %187 = arith.divf %185, %186 : vector<2x128xf32>
    %188 = math.tanh %182 : vector<2x128xf32>
    %189 = vector.extract_strided_slice %187 {offsets = [0, 32], sizes = [2, 32], strides = [1, 1]} : vector<2x128xf32> to vector<2x32xf32>
    %190 = arith.mulf %189, %157 : vector<2x32xf32>
    %191 = vector.extract_strided_slice %187 {offsets = [0, 0], sizes = [2, 32], strides = [1, 1]} : vector<2x128xf32> to vector<2x32xf32>
    %192 = vector.extract_strided_slice %188 {offsets = [0, 64], sizes = [2, 32], strides = [1, 1]} : vector<2x128xf32> to vector<2x32xf32>
    %193 = arith.mulf %191, %192 : vector<2x32xf32>
    %194 = arith.addf %190, %193 : vector<2x32xf32>
    %195 = vector.extract_strided_slice %187 {offsets = [0, 96], sizes = [2, 32], strides = [1, 1]} : vector<2x128xf32> to vector<2x32xf32>
    %196 = math.tanh %194 : vector<2x32xf32>
    %197 = arith.mulf %195, %196 : vector<2x32xf32>
    %198 = vector.extract_strided_slice %11 {offsets = [0, 5, 0], sizes = [2, 1, 128], strides = [1, 1, 1]} : vector<2x8x128xf32> to vector<2x1x128xf32>
    %199 = vector.shape_cast %198 : vector<2x1x128xf32> to vector<2x128xf32>
    %cst_28 = arith.constant dense<0.000000e+00> : vector<2x128xf32>
    %200 = tpu.matmul %179, %1, %cst_28 {dimension_numbers = #tpu.dot_dimension_numbers<[1], [0], [0], [1], [0, 0, 1, 1], [], []>} : vector<2x32xf32>, vector<32x128xf32>, vector<2x128xf32> -> vector<2x128xf32>
    %201 = arith.addf %199, %200 : vector<2x128xf32>
    %202 = arith.negf %201 : vector<2x128xf32>
    %203 = math.exp %202 : vector<2x128xf32>
    %cst_29 = arith.constant 1.000000e+00 : f32
    %204 = vector.broadcast %cst_29 : f32 to vector<2x128xf32>
    %205 = arith.addf %204, %203 : vector<2x128xf32>
    %206 = arith.divf %204, %205 : vector<2x128xf32>
    %207 = math.tanh %201 : vector<2x128xf32>
    %208 = vector.extract_strided_slice %206 {offsets = [0, 32], sizes = [2, 32], strides = [1, 1]} : vector<2x128xf32> to vector<2x32xf32>
    %209 = arith.mulf %208, %176 : vector<2x32xf32>
    %210 = vector.extract_strided_slice %206 {offsets = [0, 0], sizes = [2, 32], strides = [1, 1]} : vector<2x128xf32> to vector<2x32xf32>
    %211 = vector.extract_strided_slice %207 {offsets = [0, 64], sizes = [2, 32], strides = [1, 1]} : vector<2x128xf32> to vector<2x32xf32>
    %212 = arith.mulf %210, %211 : vector<2x32xf32>
    %213 = arith.addf %209, %212 : vector<2x32xf32>
    %214 = vector.extract_strided_slice %206 {offsets = [0, 96], sizes = [2, 32], strides = [1, 1]} : vector<2x128xf32> to vector<2x32xf32>
    %215 = math.tanh %213 : vector<2x32xf32>
    %216 = arith.mulf %214, %215 : vector<2x32xf32>
    %217 = tpu.concatenate %216, %197 in 1 : vector<2x32xf32>, vector<2x32xf32> -> vector<2x64xf32>
    %cst_30 = arith.constant dense<0.000000e+00> : vector<2x128xf32>
    %218 = tpu.matmul %217, %2, %cst_30 {dimension_numbers = #tpu.dot_dimension_numbers<[1], [0], [0], [1], [0, 0, 1, 1], [], []>} : vector<2x64xf32>, vector<64x128xf32>, vector<2x128xf32> -> vector<2x128xf32>
    %219 = arith.addf %218, %6 : vector<2x128xf32>
    %220 = arith.negf %219 : vector<2x128xf32>
    %221 = math.exp %220 : vector<2x128xf32>
    %cst_31 = arith.constant 1.000000e+00 : f32
    %222 = vector.broadcast %cst_31 : f32 to vector<2x128xf32>
    %223 = arith.addf %222, %221 : vector<2x128xf32>
    %224 = arith.divf %222, %223 : vector<2x128xf32>
    %225 = math.tanh %219 : vector<2x128xf32>
    %226 = vector.extract_strided_slice %224 {offsets = [0, 32], sizes = [2, 32], strides = [1, 1]} : vector<2x128xf32> to vector<2x32xf32>
    %227 = arith.mulf %226, %194 : vector<2x32xf32>
    %228 = vector.extract_strided_slice %224 {offsets = [0, 0], sizes = [2, 32], strides = [1, 1]} : vector<2x128xf32> to vector<2x32xf32>
    %229 = vector.extract_strided_slice %225 {offsets = [0, 64], sizes = [2, 32], strides = [1, 1]} : vector<2x128xf32> to vector<2x32xf32>
    %230 = arith.mulf %228, %229 : vector<2x32xf32>
    %231 = arith.addf %227, %230 : vector<2x32xf32>
    %232 = vector.extract_strided_slice %224 {offsets = [0, 96], sizes = [2, 32], strides = [1, 1]} : vector<2x128xf32> to vector<2x32xf32>
    %233 = math.tanh %231 : vector<2x32xf32>
    %234 = arith.mulf %232, %233 : vector<2x32xf32>
    %235 = vector.extract_strided_slice %11 {offsets = [0, 6, 0], sizes = [2, 1, 128], strides = [1, 1, 1]} : vector<2x8x128xf32> to vector<2x1x128xf32>
    %236 = vector.shape_cast %235 : vector<2x1x128xf32> to vector<2x128xf32>
    %cst_32 = arith.constant dense<0.000000e+00> : vector<2x128xf32>
    %237 = tpu.matmul %216, %1, %cst_32 {dimension_numbers = #tpu.dot_dimension_numbers<[1], [0], [0], [1], [0, 0, 1, 1], [], []>} : vector<2x32xf32>, vector<32x128xf32>, vector<2x128xf32> -> vector<2x128xf32>
    %238 = arith.addf %236, %237 : vector<2x128xf32>
    %239 = arith.negf %238 : vector<2x128xf32>
    %240 = math.exp %239 : vector<2x128xf32>
    %cst_33 = arith.constant 1.000000e+00 : f32
    %241 = vector.broadcast %cst_33 : f32 to vector<2x128xf32>
    %242 = arith.addf %241, %240 : vector<2x128xf32>
    %243 = arith.divf %241, %242 : vector<2x128xf32>
    %244 = math.tanh %238 : vector<2x128xf32>
    %245 = vector.extract_strided_slice %243 {offsets = [0, 32], sizes = [2, 32], strides = [1, 1]} : vector<2x128xf32> to vector<2x32xf32>
    %246 = arith.mulf %245, %213 : vector<2x32xf32>
    %247 = vector.extract_strided_slice %243 {offsets = [0, 0], sizes = [2, 32], strides = [1, 1]} : vector<2x128xf32> to vector<2x32xf32>
    %248 = vector.extract_strided_slice %244 {offsets = [0, 64], sizes = [2, 32], strides = [1, 1]} : vector<2x128xf32> to vector<2x32xf32>
    %249 = arith.mulf %247, %248 : vector<2x32xf32>
    %250 = arith.addf %246, %249 : vector<2x32xf32>
    %251 = vector.extract_strided_slice %243 {offsets = [0, 96], sizes = [2, 32], strides = [1, 1]} : vector<2x128xf32> to vector<2x32xf32>
    %252 = math.tanh %250 : vector<2x32xf32>
    %253 = arith.mulf %251, %252 : vector<2x32xf32>
    %254 = tpu.concatenate %253, %234 in 1 : vector<2x32xf32>, vector<2x32xf32> -> vector<2x64xf32>
    %cst_34 = arith.constant dense<0.000000e+00> : vector<2x128xf32>
    %255 = tpu.matmul %254, %2, %cst_34 {dimension_numbers = #tpu.dot_dimension_numbers<[1], [0], [0], [1], [0, 0, 1, 1], [], []>} : vector<2x64xf32>, vector<64x128xf32>, vector<2x128xf32> -> vector<2x128xf32>
    %256 = arith.addf %255, %6 : vector<2x128xf32>
    %257 = arith.negf %256 : vector<2x128xf32>
    %258 = math.exp %257 : vector<2x128xf32>
    %cst_35 = arith.constant 1.000000e+00 : f32
    %259 = vector.broadcast %cst_35 : f32 to vector<2x128xf32>
    %260 = arith.addf %259, %258 : vector<2x128xf32>
    %261 = arith.divf %259, %260 : vector<2x128xf32>
    %262 = math.tanh %256 : vector<2x128xf32>
    %263 = vector.extract_strided_slice %261 {offsets = [0, 32], sizes = [2, 32], strides = [1, 1]} : vector<2x128xf32> to vector<2x32xf32>
    %264 = arith.mulf %263, %231 : vector<2x32xf32>
    %265 = vector.extract_strided_slice %261 {offsets = [0, 0], sizes = [2, 32], strides = [1, 1]} : vector<2x128xf32> to vector<2x32xf32>
    %266 = vector.extract_strided_slice %262 {offsets = [0, 64], sizes = [2, 32], strides = [1, 1]} : vector<2x128xf32> to vector<2x32xf32>
    %267 = arith.mulf %265, %266 : vector<2x32xf32>
    %268 = arith.addf %264, %267 : vector<2x32xf32>
    %269 = vector.extract_strided_slice %261 {offsets = [0, 96], sizes = [2, 32], strides = [1, 1]} : vector<2x128xf32> to vector<2x32xf32>
    %270 = math.tanh %268 : vector<2x32xf32>
    %271 = arith.mulf %269, %270 : vector<2x32xf32>
    %272 = vector.extract_strided_slice %11 {offsets = [0, 7, 0], sizes = [2, 1, 128], strides = [1, 1, 1]} : vector<2x8x128xf32> to vector<2x1x128xf32>
    %273 = vector.shape_cast %272 : vector<2x1x128xf32> to vector<2x128xf32>
    %cst_36 = arith.constant dense<0.000000e+00> : vector<2x128xf32>
    %274 = tpu.matmul %253, %1, %cst_36 {dimension_numbers = #tpu.dot_dimension_numbers<[1], [0], [0], [1], [0, 0, 1, 1], [], []>} : vector<2x32xf32>, vector<32x128xf32>, vector<2x128xf32> -> vector<2x128xf32>
    %275 = arith.addf %273, %274 : vector<2x128xf32>
    %276 = arith.negf %275 : vector<2x128xf32>
    %277 = math.exp %276 : vector<2x128xf32>
    %cst_37 = arith.constant 1.000000e+00 : f32
    %278 = vector.broadcast %cst_37 : f32 to vector<2x128xf32>
    %279 = arith.addf %278, %277 : vector<2x128xf32>
    %280 = arith.divf %278, %279 : vector<2x128xf32>
    %281 = math.tanh %275 : vector<2x128xf32>
    %282 = vector.extract_strided_slice %280 {offsets = [0, 32], sizes = [2, 32], strides = [1, 1]} : vector<2x128xf32> to vector<2x32xf32>
    %283 = arith.mulf %282, %250 : vector<2x32xf32>
    %284 = vector.extract_strided_slice %280 {offsets = [0, 0], sizes = [2, 32], strides = [1, 1]} : vector<2x128xf32> to vector<2x32xf32>
    %285 = vector.extract_strided_slice %281 {offsets = [0, 64], sizes = [2, 32], strides = [1, 1]} : vector<2x128xf32> to vector<2x32xf32>
    %286 = arith.mulf %284, %285 : vector<2x32xf32>
    %287 = arith.addf %283, %286 : vector<2x32xf32>
    %288 = vector.extract_strided_slice %280 {offsets = [0, 96], sizes = [2, 32], strides = [1, 1]} : vector<2x128xf32> to vector<2x32xf32>
    %289 = math.tanh %287 : vector<2x32xf32>
    %290 = arith.mulf %288, %289 : vector<2x32xf32>
    %291 = tpu.concatenate %290, %271 in 1 : vector<2x32xf32>, vector<2x32xf32> -> vector<2x64xf32>
    %cst_38 = arith.constant dense<0.000000e+00> : vector<2x128xf32>
    %292 = tpu.matmul %291, %2, %cst_38 {dimension_numbers = #tpu.dot_dimension_numbers<[1], [0], [0], [1], [0, 0, 1, 1], [], []>} : vector<2x64xf32>, vector<64x128xf32>, vector<2x128xf32> -> vector<2x128xf32>
    %293 = arith.addf %292, %6 : vector<2x128xf32>
    %294 = arith.negf %293 : vector<2x128xf32>
    %295 = math.exp %294 : vector<2x128xf32>
    %cst_39 = arith.constant 1.000000e+00 : f32
    %296 = vector.broadcast %cst_39 : f32 to vector<2x128xf32>
    %297 = arith.addf %296, %295 : vector<2x128xf32>
    %298 = arith.divf %296, %297 : vector<2x128xf32>
    %299 = math.tanh %293 : vector<2x128xf32>
    %300 = vector.extract_strided_slice %298 {offsets = [0, 32], sizes = [2, 32], strides = [1, 1]} : vector<2x128xf32> to vector<2x32xf32>
    %301 = arith.mulf %300, %268 : vector<2x32xf32>
    %302 = vector.extract_strided_slice %298 {offsets = [0, 0], sizes = [2, 32], strides = [1, 1]} : vector<2x128xf32> to vector<2x32xf32>
    %303 = vector.extract_strided_slice %299 {offsets = [0, 64], sizes = [2, 32], strides = [1, 1]} : vector<2x128xf32> to vector<2x32xf32>
    %304 = arith.mulf %302, %303 : vector<2x32xf32>
    %305 = arith.addf %301, %304 : vector<2x32xf32>
    %306 = vector.extract_strided_slice %298 {offsets = [0, 96], sizes = [2, 32], strides = [1, 1]} : vector<2x128xf32> to vector<2x32xf32>
    %307 = math.tanh %305 : vector<2x32xf32>
    %308 = arith.mulf %306, %307 : vector<2x32xf32>
    %c128 = arith.constant 128 : index
    %c0_40 = arith.constant 0 : index
    %309 = vector.load %arg1[%c128, %c0_40] : memref<168x128xf32, #tpu.memory_space<vmem>>, vector<32x128xf32>
    %c160 = arith.constant 160 : index
    %c0_41 = arith.constant 0 : index
    %310 = vector.load %arg1[%c160, %c0_41] : memref<168x128xf32, #tpu.memory_space<vmem>>, vector<1x128xf32>
    %cst_42 = arith.constant dense<0.000000e+00> : vector<2x128xf32>
    %311 = tpu.matmul %308, %309, %cst_42 {dimension_numbers = #tpu.dot_dimension_numbers<[1], [0], [0], [1], [0, 0, 1, 1], [], []>} : vector<2x32xf32>, vector<32x128xf32>, vector<2x128xf32> -> vector<2x128xf32>
    %312 = vector.broadcast %310 : vector<1x128xf32> to vector<2x128xf32>
    %313 = arith.addf %311, %312 : vector<2x128xf32>
    %314 = vector.extract_strided_slice %313 {offsets = [0, 0], sizes = [2, 9], strides = [1, 1]} : vector<2x128xf32> to vector<2x9xf32>
    %c0_43 = arith.constant 0 : index
    %c0_44 = arith.constant 0 : index
    %315 = vector.load %arg2[%c0_43, %c0_44] : memref<2x9xf32, #tpu.memory_space<vmem>>, vector<2x9xf32>
    tpu.vector_store %arg2[%c0_43, %c0_44], %314 {strides = array<i32>} : memref<2x9xf32, #tpu.memory_space<vmem>>, vector<2x9xf32>,
    return
  }
}

</mosaic_0001>

<bundles_post_ra>
// kernel: tpu_custom_call.1
= control target key start
LH: loop header
LB: loop body
LE: loop exit
PB: predicated region body
PF: predicated region fallthrough
CT: control target
= control target key end

     0   :  { %7 = vsyncpa [#allocation3], 0  ;;  %s3544_s0 = inlined_call_operand.hbm [shape: f32[16,9], index: 0, kind: input, shape index: {}]   ;;  %s3545_s1 = inlined_call_operand.hbm [shape: f32[168,128], index: 1, kind: input, shape index: {}]   ;;  %s3546_s2 = inlined_call_operand.hbm [shape: f32[2,9], index: 2, kind: output, shape index: {}]  }
   0x1   :  { %8 = vsyncpa [#allocation6], 0 }
   0x2   :  { %9 = vsyncpa [#allocation4], 0  ;;  %s3094_s9 = smov [#allocation2]   ;;  %s3022_s13 = scalar_lea.hbm %s3544_s0, 256 }
   0x3   :  { %s15_s10 = sshll.u32 %s3094_s9, 4  ;;  %p3023_p0 = scmp.ne.s32.totalorder %s3544_s0, %s3022_s13  ;;  %s16_s10 = int_to_ptr.vmem [resolvable:$true] %s15_s10 }
   0x4   :  { %p3026_p1 = scmp.lt.u32.totalorder %s3022_s13, %s3544_s0 }
   0x6   :  { %p3028_p2 = pnand %p3026_p1, %p3023_p0 }
   0x8   :  { %3031 = shalt.err (!%p3028_p2)
}
   0x9   :  { %s3032_s18 = scalar_lea.vmem %s16_s10, 256  ;;  %p3037_p4 = scmp.lt.s32.totalorder %s16_s10, %s16_s10 }
   0xa   :  { %p3033_p3 = scmp.ne.s32.totalorder %s16_s10, %s3032_s18  ;;  %p3038_p5 = scmp.lt.s32.totalorder %s3032_s18, %s3032_s18 }
   0xc   :  { %p3039_p6 = por %p3038_p5, %p3037_p4 }
   0xe   :  { %p3040_p7 = pnand %p3039_p6, %p3033_p3 }
  0x10   :  { %3043 = shalt.err (!%p3040_p7)
}
  0x11   :  { %s3095_s19 = smov 128   ;;  %s3096_s20 = smov 8  }
  0x12   :  { %21 = dma.hbm_to_vmem [thread:$0]  %s3544_s0, 256, %s16_s10, [#allocation3], %s3095_s19, %s3095_s19, %s3096_s20  }
  0x13   :  { %s3097_s23 = smov [#allocation5]   ;;  %s3044_s27 = scalar_lea.hbm %s3545_s1, 2688 }
  0x14   :  { %s27_s24 = sshll.u32 %s3097_s23, 4  ;;  %p3045_p8 = scmp.ne.s32.totalorder %s3545_s1, %s3044_s27  ;;  %s28_s24 = int_to_ptr.vmem [resolvable:$true] %s27_s24 }
  0x15   :  { %p3048_p9 = scmp.lt.u32.totalorder %s3044_s27, %s3545_s1 }
  0x17   :  { %p3050_p10 = pnand %p3048_p9, %p3045_p8 }
  0x19   :  { %3053 = shalt.err (!%p3050_p10)
}
  0x1a   :  { %s3054_s4 = scalar_lea.vmem %s28_s24, 2688  ;;  %p3059_p12 = scmp.lt.s32.totalorder %s28_s24, %s28_s24 }
  0x1b   :  { %p3055_p11 = scmp.ne.s32.totalorder %s28_s24, %s3054_s4  ;;  %p3060_p13 = scmp.lt.s32.totalorder %s3054_s4, %s3054_s4 }
  0x1d   :  { %p3061_p0 = por %p3060_p13, %p3059_p12 }
  0x1f   :  { %p3062_p1 = pnand %p3061_p0, %p3055_p11 }
  0x21   :  { %3065 = shalt.err (!%p3062_p1)
}
  0x22   :  { %33 = dma.hbm_to_vmem [thread:$0]  %s3545_s1, 2688, %s28_s24, [#allocation6], %s3095_s19, %s3095_s19, %s3096_s20  }
  0x23   :  { %3088 = dma.done.wait [#allocation3], 256  }
  0x24   :  { %3089 = vsyncadd [#allocation3], 4294967040 }
  0x25   :  { %3090 = dma.done.wait [#allocation6], 2688  }
  0x26   :  { %3091 = vsyncadd [#allocation6], 4294964608  ;;  %v3098_v0 = vmov 0.0|0.0   ;;  %vm3099_vm0 = vmmov 0   ;;  %v3100_v1 = vmov 0.0   ;;  %vm73_vm1 = vcmask 1040384  }
  0x27   :  { %2668 = vmatprep.subr.bf16.mxu1 %v3098_v0  ;;  %2419 = vmatprep.mubr.msk.f32.mxu1 %vm3099_vm0, %v3100_v1  ;;  %vm3101_vm2 = vmmov 1   ;;  %vm66_vm4 = vcmask 72704   ;;  %v40_v2 = vld [vmem:[#allocation5] sm:$0xff]  ;;  %v41_v3 = vld [vmem:[#allocation5 + $0x8] sm:$0x1]  ;;  %v42_v4 = vld [vmem:[#allocation5 + $0x10] sm:$0xff] }
  0x28   :  { %vm2663_vm3 = vmpackc.low %vm73_vm1, %vm3101_vm2  ;;  %v2662_v5 = vpack.c.bf16 %v41_v3, %v40_v2  ;;  %v43_v6 = vld [vmem:[#allocation5 + $0x18] sm:$0xff]  ;;  %v60_v7 = vld [vmem:[#allocation2] sm:$0xff]  ;;  %s3102_s1 = smov 64   ;;  %s3103_s6 = smov 32   ;;  %vm283_vm5 = vcmask 1041409   ;;  %vm152_vm6 = vcmask 261120  }
  0x29   :  { %v3148_v8 = vpack.c.bf16 %v43_v6, %v42_v4  ;;  %2408 = vmatprep.mubr.msk.f32.mxu0 %vm66_vm4, %v60_v7  ;;  %v44_v9 = vld [vmem:[#allocation5 + $0x20] sm:$0xff]  ;;  %v45_v10 = vld [vmem:[#allocation5 + $0x28] sm:$0xff]  ;;  %v61_v11 = vld [vmem:[#allocation2 + $0x8] sm:$0xff]  ;;  %vm289_vm7 = vcmask 523264   ;;  %vm522_vm8 = vcmask 1042434   ;;  %vm771_vm9 = vcmask 1043459  }
  0x2a   :  { %2664 = vmatprep.subr.msk.bf16.mxu0 %vm2663_vm3, %v2662_v5  ;;  %v3152_v12 = vpack.c.bf16 %v45_v10, %v44_v9  ;;  %v2238_v15 = vld [vmem:[#allocation5 + $0x70] ss:$0 sm:$0xff]  ;;  %v47_v44 = vld [vmem:[#allocation5 + $0x38] sm:$0xff]  ;;  %v48_v45 = vld [vmem:[#allocation5 + $0x40] sm:$0xff]  ;;  %vm1021_vm10 = vcmask 1044484   ;;  %vm1271_vm11 = vcmask 1045509  }
  0x2b   :  { %2670 = vmatpush3.bf16.msra.mxu1 %v3148_v8  ;;  %2667 = vmatpush3.bf16.msk.msra.mxu0 %vm2663_vm3, %v2662_v5  ;;  %v46_v43 = vld [vmem:[#allocation5 + $0x30] sm:$0xff]  ;;  %v49_v47 = vld [vmem:[#allocation5 + $0x48] sm:$0xff]  ;;  %v51_v50 = vld [vmem:[#allocation5 + $0x58] sm:$0xff]  ;;  %vm1521_vm12 = vcmask 1046534   ;;  %vm1771_vm13 = vcmask 1047559   ;;  %s3104_s7 = smov [#allocation7]  }
  0x2c   :  { %2671 = vmatprep.subr.bf16.mxu1 %v3098_v0  ;;  %2674 = vmatprep.subr.bf16.mxu0 %v3098_v0  ;;  %v3184_v46 = vpack.c.bf16 %v47_v44, %v46_v43  ;;  %v3187_v48 = vpack.c.bf16 %v49_v47, %v48_v45  ;;  %v50_v49 = vld [vmem:[#allocation5 + $0x50] sm:$0xff]  ;;  %v52_v53 = vld [vmem:[#allocation5 + $0x60] sm:$0xff]  ;;  %v53_v54 = vld [vmem:[#allocation5 + $0x68] sm:$0xff]  ;;  %s2227_s8 = sshll.u32 %s3104_s7, 4  ;;  %vm2219_vm14 = vcmask 66560   ;;  %s2228_s8 = int_to_ptr.vmem [resolvable:$true] %s2227_s8 }
  0x2d   :  { %v3192_v52 = vpack.c.bf16 %v51_v50, %v50_v49  ;;  %v3197_v56 = vpack.c.bf16 %v53_v54, %v52_v53  ;;  %s3066_s9 = scalar_lea.vmem %s2228_s8, 32  ;;  %p3071_p3 = scmp.lt.s32.totalorder %s2228_s8, %s2228_s8 }
  0x2e   :  { %2409 = vmatmul.mubr.msk.f32.vlgmr.msra.gmra.mrb[0].mxu0 %vm66_vm4, %v61_v11  ;;  %v3225_v11 = vld [vmem:[#allocation5 + $0x78] ss:$0 sm:$0xff]  ;;  %p3067_p2 = scmp.ne.s32.totalorder %s2228_s8, %s3066_s9  ;;  %p3072_p4 = scmp.lt.s32.totalorder %s3066_s9, %s3066_s9 }
  0x2f   :  { %2673 = vmatpush3.bf16.msra.mxu1 %v3152_v12  ;;  %2438 = vmatprep.mubr.msk.f32.mxu0 %vm3099_vm0, %v3100_v1 }
  0x30   :  { %2686 = vmatprep.subr.bf16.mxu1 %v3098_v0  ;;  %2676 = vmatpush3.bf16.msra.mxu0 %v3184_v46  ;;  %p3073_p5 = por %p3072_p4, %p3071_p3 }
  0x31   :  { %2677 = vmatprep.subr.bf16.mxu0 %v3098_v0 }
  0x32   :  { %2420 = vmatmul.mubr.f32.vlgmr.msra.gmra.mrb[0].mxu1 %v3100_v1  ;;  %p3074_p6 = pnand %p3073_p5, %p3067_p2 }
  0x33   :  { %2688 = vmatpush3.bf16.msra.mxu1 %v3148_v8  ;;  %2449 = vmatprep.mubr.msk.f32.mxu1 %vm3099_vm0, %v3100_v1 }
  0x34   :  { %2689 = vmatprep.subr.bf16.mxu1 %v3098_v0  ;;  %2679 = vmatpush3.bf16.msra.mxu0 %v3187_v48 }
  0x35   :  { %2680 = vmatprep.subr.bf16.mxu0 %v3098_v0 }
  0x37   :  { %2691 = vmatpush3.bf16.msra.mxu1 %v3152_v12 }
  0x38   :  { %2692 = vmatprep.subr.bf16.mxu1 %v3098_v0  ;;  %2682 = vmatpush3.bf16.msra.mxu0 %v3192_v52 }
  0x39   :  { %2683 = vmatprep.subr.bf16.mxu0 %v3098_v0 }
  0x3c   :  { %2685 = vmatpush3.bf16.msra.mxu0 %v3197_v56 }
  0x3d   :  { %2704 = vmatprep.subr.bf16.mxu0 %v3098_v0 }
 0x101   :  { %v2410_v13 = vpop.f32.mrb[0].mxu0 }
 0x102   :  { %v143_v14 = vpop.f32.mrb[1].mxu0  ;;  %v3168_v16 = vadd.f32 %v2410_v13, %v2238_v15 }
 0x103   :  { %v3170_v20 = vadd.f32 %v2238_v15, %v143_v14 }
 0x105   :  { %v222_v17 = vpop.f32.mrb[0].mxu1 }
 0x106   :  { %v227_v18 = vrot.slane %v222_v17, 1  ;;  %v2421_v19 = vpop.f32.mrb[1].mxu1  ;;  %v230_v22 = vadd.f32 %v222_v17, %v3170_v20 }
 0x108   :  { %v231_v21 = vadd.f32 %v227_v18, %v3168_v16  ;;  %v2242_v26 = vmul.f32 -1.442695, %v230_v22 }
 0x10a   :  { %2829 = vtanh.f32 %v231_v21  ;;  %v2243_v25 = vmul.f32 -1.442695, %v231_v21 }
 0x10b   :  { %2831 = vtanh.f32 %v230_v22 }
 0x10c   :  { %2833 = vpow2.f32 %v2243_v25 }
 0x10d   :  { %2835 = vpow2.f32 %v2242_v26 }
 0x114   :  { %v2830_v23 = vpop.eup %2829 }
 0x115   :  { %252 = vrot.lane.b32.xlu0 %v2830_v23, %s3102_s1  ;;  %v2832_v24 = vpop.eup %2831 }
 0x116   :  { %v2834_v27 = vpop.eup %2833 }
 0x117   :  { %v239_v28 = vadd.f32 1.0, %v2834_v27  ;;  %v2836_v29 = vpop.eup %2835 }
 0x118   :  { %v238_v30 = vadd.f32 1.0, %v2836_v29 }
 0x119   :  { %250 = vrot.lane.b32.xlu0 %v2832_v24, %s3102_s1  ;;  %2837 = vrcp.f32 %v239_v28 }
 0x11a   :  { %2839 = vrcp.f32 %v238_v30 }
 0x123   :  { %v2838_v31 = vpop.eup %2837 }
 0x124   :  { %v2840_v34 = vpop.eup %2839  ;;  %v247_v37 = vmul.f32 0.0, %v2838_v31 }
 0x125   :  { %v246_v40 = vmul.f32 0.0, %v2840_v34 }
 0x187   :  { %v253_v32 = vpop.permute.xlu0 %252 }
 0x188   :  { %v257_v33 = vmul.f32 %v2838_v31, %v253_v32 }
 0x18a   :  { %262 = vrot.lane.b32.xlu1 %v257_v33, %s3103_s6 }
 0x18b   :  { %v251_v35 = vpop.permute.xlu0 %250 }
 0x18c   :  { %v256_v36 = vmul.f32 %v2840_v34, %v251_v35 }
 0x18e   :  { %260 = vrot.lane.b32.xlu1 %v256_v36, %s3103_s6 }
 0x1fc   :  { %v263_v38 = vpop.permute.xlu1 %262 }
 0x1fd   :  { %v3178_v39 = vadd.f32 %v263_v38, %v247_v37 }
 0x1ff   :  { %2841 = vtanh.f32 %v3178_v39  ;;  %v482_v37 = vrot.slane %v3178_v39, 7 }
 0x200   :  { %v261_v41 = vpop.permute.xlu1 %260 }
 0x201   :  { %v3181_v42 = vadd.f32 %v261_v41, %v246_v40 }
 0x203   :  { %2843 = vtanh.f32 %v3181_v42  ;;  %v481_v40 = vrot.slane %v3181_v42, 7 }
 0x209   :  { %v2842_v51 = vpop.eup %2841 }
 0x20a   :  { %274 = vrot.lane.b32.xlu0 %v2842_v51, %s3102_s1 }
 0x20d   :  { %v2844_v55 = vpop.eup %2843 }
 0x20e   :  { %272 = vrot.lane.b32.xlu1 %v2844_v55, %s3102_s1 }
 0x27c   :  { %v275_v57 = vpop.permute.xlu0 %274 }
 0x27d   :  { %v279_v58 = vmul.f32 %v2838_v31, %v275_v57 }
 0x27f   :  { %v282_v60 = vrot.slane %v279_v58, 7 }
 0x280   :  { %v273_v59 = vpop.permute.xlu1 %272 }
 0x281   :  { %v278_v61 = vmul.f32 %v2840_v34, %v273_v59 }
 0x283   :  { %v284_v62 = vsel %vm283_vm5, %v282_v60, %v278_v61 }
 0x284   :  { %285 = vrot.lane.b32.xlu0 %v284_v62, %s3103_s6 }
 0x2f6   :  { %v286_v63 = vpop.permute.xlu0 %285 }
 0x2f7   :  { %v288_v2 = vsel %vm152_vm6, %v286_v63, 0.0  ;;  %2450 = vmatmul.mubr.msk.f32.vlgmr.msra.gmra.mrb[2].mxu1 %vm152_vm6, %v286_v63 }
 0x2f8   :  { %2439 = vmatmul.mubr.msk.f32.vlgmr.msra.gmra.mrb[2].mxu0 %vm289_vm7, %v288_v2  ;;  %2694 = vmatpush3.bf16.msra.mxu1 %v3184_v46 }
 0x2f9   :  { %2695 = vmatprep.subr.bf16.mxu1 %v3098_v0  ;;  %2706 = vmatpush3.bf16.msra.mxu0 %v3148_v8 }
 0x2fa   :  { %2707 = vmatprep.subr.bf16.mxu0 %v3098_v0  ;;  %2479 = vmatprep.mubr.msk.f32.mxu0 %vm3099_vm0, %v3100_v1 }
 0x2fb   :  { %2468 = vmatprep.mubr.msk.f32.mxu1 %vm3099_vm0, %v3100_v1 }
 0x2fc   :  { %2697 = vmatpush3.bf16.msra.mxu1 %v3187_v48 }
 0x2fd   :  { %2698 = vmatprep.subr.bf16.mxu1 %v3098_v0  ;;  %2709 = vmatpush3.bf16.msra.mxu0 %v3152_v12 }
 0x2fe   :  { %2710 = vmatprep.subr.bf16.mxu0 %v3098_v0 }
 0x300   :  { %2700 = vmatpush3.bf16.msra.mxu1 %v3192_v52 }
 0x301   :  { %2701 = vmatprep.subr.bf16.mxu1 %v3098_v0 }
 0x304   :  { %2703 = vmatpush3.bf16.msra.mxu1 %v3197_v56 }
 0x305   :  { %2722 = vmatprep.subr.bf16.mxu1 %v3098_v0 }
 0x3ca   :  { %v455_v3 = vpop.f32.mrb[2].mxu1 }
 0x3cb   :  { %v460_v4 = vrot.slane %v455_v3, 7  ;;  %v464_v5 = vadd.f32 %v455_v3, %v3168_v16  ;;  %v359_v6 = vpop.f32.mrb[2].mxu0  ;;  %v2451_v7 = vpop.f32.mrb[3].mxu1 }
 0x3cc   :  { %v2440_v9 = vpop.f32.mrb[3].mxu0  ;;  %v360_v13 = vadd.f32 %v3225_v11, %v359_v6 }
 0x3cd   :  { %v463_v10 = vadd.f32 %v460_v4, %v3170_v20  ;;  %2845 = vtanh.f32 %v464_v5  ;;  %v2248_v18 = vmul.f32 -1.442695, %v464_v5 }
 0x3ce   :  { %v2245_v21 = vmul.f32 -1.442695, %v360_v13 }
 0x3cf   :  { %2847 = vtanh.f32 %v463_v10  ;;  %v2247_v19 = vmul.f32 -1.442695, %v463_v10 }
 0x3d0   :  { %2849 = vtanh.f32 %v360_v13 }
 0x3d1   :  { %2851 = vpow2.f32 %v2248_v18 }
 0x3d2   :  { %2853 = vpow2.f32 %v2247_v19 }
 0x3d3   :  { %2855 = vpow2.f32 %v2245_v21 }
 0x3d7   :  { %v2846_v14 = vpop.eup %2845 }
 0x3d8   :  { %491 = vrot.lane.b32.xlu0 %v2846_v14, %s3102_s1 }
 0x3d9   :  { %v2848_v15 = vpop.eup %2847 }
 0x3da   :  { %489 = vrot.lane.b32.xlu1 %v2848_v15, %s3102_s1  ;;  %v2850_v17 = vpop.eup %2849 }
 0x3db   :  { %v2852_v22 = vpop.eup %2851 }
 0x3dc   :  { %v2854_v23 = vpop.eup %2853  ;;  %v472_v24 = vadd.f32 1.0, %v2852_v22 }
 0x3dd   :  { %v471_v25 = vadd.f32 1.0, %v2854_v23  ;;  %v2856_v26 = vpop.eup %2855 }
 0x3de   :  { %372 = vrot.lane.b32.xlu1 %v2850_v17, %s3102_s1  ;;  %2857 = vrcp.f32 %v472_v24  ;;  %v366_v27 = vadd.f32 1.0, %v2856_v26 }
 0x3df   :  { %2859 = vrcp.f32 %v471_v25 }
 0x3e0   :  { %2861 = vrcp.f32 %v366_v27 }
 0x3e8   :  { %v2858_v28 = vpop.eup %2857 }
 0x3e9   :  { %v2860_v31 = vpop.eup %2859  ;;  %v486_v38 = vmul.f32 %v2858_v28, %v482_v37 }
 0x3ea   :  { %v2862_v34 = vpop.eup %2861  ;;  %v485_v44 = vmul.f32 %v2860_v31, %v481_v40 }
 0x3eb   :  { %v370_v49 = vmul.f32 0.0, %v2862_v34 }
 0x44a   :  { %v492_v29 = vpop.permute.xlu0 %491 }
 0x44b   :  { %v496_v30 = vmul.f32 %v2858_v28, %v492_v29 }
 0x44c   :  { %v490_v32 = vpop.permute.xlu1 %489 }
 0x44d   :  { %501 = vrot.lane.b32.xlu1 %v496_v30, %s3103_s6  ;;  %v495_v33 = vmul.f32 %v2860_v31, %v490_v32 }
 0x44f   :  { %499 = vrot.lane.b32.xlu0 %v495_v33, %s3103_s6 }
 0x450   :  { %v373_v35 = vpop.permute.xlu1 %372 }
 0x451   :  { %v375_v36 = vmul.f32 %v2862_v34, %v373_v35 }
 0x453   :  { %377 = vrot.lane.b32.xlu0 %v375_v36, %s3103_s6 }
 0x4bf   :  { %v502_v41 = vpop.permute.xlu1 %501 }
 0x4c0   :  { %v3236_v43 = vadd.f32 %v502_v41, %v486_v38 }
 0x4c1   :  { %v500_v45 = vpop.permute.xlu0 %499 }
 0x4c2   :  { %2863 = vtanh.f32 %v3236_v43  ;;  %v3239_v47 = vadd.f32 %v500_v45, %v485_v44 }
 0x4c4   :  { %2865 = vtanh.f32 %v3239_v47 }
 0x4c5   :  { %v378_v50 = vpop.permute.xlu0 %377 }
 0x4c6   :  { %v3242_v51 = vadd.f32 %v378_v50, %v370_v49  ;;  %v730_v50 = vrot.slane %v3239_v47, 7 }
 0x4c8   :  { %2867 = vtanh.f32 %v3242_v51 }
 0x4cc   :  { %v2864_v39 = vpop.eup %2863 }
 0x4cd   :  { %513 = vrot.lane.b32.xlu0 %v2864_v39, %s3102_s1  ;;  %v731_v39 = vrot.slane %v3236_v43, 7 }
 0x4ce   :  { %v2866_v42 = vpop.eup %2865 }
 0x4cf   :  { %511 = vrot.lane.b32.xlu1 %v2866_v42, %s3102_s1 }
 0x4d2   :  { %v2868_v53 = vpop.eup %2867 }
 0x4d3   :  { %383 = vrot.lane.b32.xlu1 %v2868_v53, %s3102_s1 }
 0x53f   :  { %v514_v54 = vpop.permute.xlu0 %513 }
 0x540   :  { %v518_v55 = vmul.f32 %v2858_v28, %v514_v54 }
 0x541   :  { %v512_v58 = vpop.permute.xlu1 %511 }
 0x542   :  { %v521_v57 = vrot.slane %v518_v55, 7  ;;  %v517_v59 = vmul.f32 %v2860_v31, %v512_v58 }
 0x544   :  { %v631_v60 = vrot.slane %v517_v59, 1  ;;  %v523_v61 = vsel %vm522_vm8, %v521_v57, %v517_v59 }
 0x545   :  { %524 = vrot.lane.b32.xlu0 %v523_v61, %s3103_s6  ;;  %v384_v62 = vpop.permute.xlu1 %383 }
 0x546   :  { %v386_v63 = vmul.f32 %v2862_v34, %v384_v62  ;;  %v632_v3 = vsel %vm283_vm5, %v518_v55, %v631_v60 }
 0x548   :  { %v528_v2 = vrot.slane %v386_v63, 7 }
 0x549   :  { %633 = vrot.lane.b32.xlu0 %v632_v3, %s3103_s6 }
 0x54a   :  { %529 = vrot.lane.b32.xlu1 %v528_v2, %s3102_s1 }
 0x5b7   :  { %v525_v4 = vpop.permute.xlu0 %524 }
 0x5bb   :  { %v634_v5 = vpop.permute.xlu0 %633 }
 0x5bc   :  { %2480 = vmatmul.mubr.msk.f32.vlgmr.msra.gmra.mrb[4].mxu0 %vm152_vm6, %v634_v5  ;;  %v530_v6 = vpop.permute.xlu1 %529 }
 0x5bd   :  { %v532_v7 = vsel %vm152_vm6, %v525_v4, %v530_v6  ;;  %2712 = vmatpush3.bf16.msra.mxu0 %v3184_v46  ;;  %2498 = vmatprep.mubr.msk.f32.mxu0 %vm3099_vm0, %v3100_v1 }
 0x5be   :  { %v534_v9 = vrot.slane %v532_v7, 1  ;;  %2713 = vmatprep.subr.bf16.mxu0 %v3098_v0 }
 0x5c0   :  { %2469 = vmatmul.mubr.msk.f32.vlgmr.msra.gmra.mrb[4].mxu1 %vm289_vm7, %v534_v9 }
 0x5c1   :  { %2715 = vmatpush3.bf16.msra.mxu0 %v3187_v48  ;;  %2724 = vmatpush3.bf16.msra.mxu1 %v3148_v8 }
 0x5c2   :  { %2716 = vmatprep.subr.bf16.mxu0 %v3098_v0  ;;  %2725 = vmatprep.subr.bf16.mxu1 %v3098_v0 }
 0x5c3   :  { %2509 = vmatprep.mubr.msk.f32.mxu1 %vm3099_vm0, %v3100_v1 }
 0x5c5   :  { %2718 = vmatpush3.bf16.msra.mxu0 %v3192_v52  ;;  %2727 = vmatpush3.bf16.msra.mxu1 %v3152_v12 }
 0x5c6   :  { %2719 = vmatprep.subr.bf16.mxu0 %v3098_v0  ;;  %2728 = vmatprep.subr.bf16.mxu1 %v3098_v0 }
 0x5c9   :  { %2721 = vmatpush3.bf16.msra.mxu0 %v3197_v56 }
 0x5ca   :  { %2740 = vmatprep.subr.bf16.mxu0 %v3098_v0 }
 0x68f   :  { %v703_v10 = vpop.f32.mrb[4].mxu0 }
 0x690   :  { %v708_v13 = vrot.slane %v703_v10, 6  ;;  %v709_v14 = vrot.slane %v703_v10, 7  ;;  %v2481_v15 = vpop.f32.mrb[5].mxu0 }
 0x692   :  { %v712_v17 = vadd.f32 %v708_v13, %v3170_v20  ;;  %v713_v18 = vadd.f32 %v709_v14, %v3168_v16 }
 0x693   :  { %v603_v19 = vpop.f32.mrb[4].mxu1 }
 0x694   :  { %2869 = vtanh.f32 %v712_v17  ;;  %v2470_v21 = vpop.f32.mrb[5].mxu1  ;;  %v604_v22 = vadd.f32 %v3225_v11, %v603_v19  ;;  %v2252_v26 = vmul.f32 -1.442695, %v712_v17  ;;  %v2253_v27 = vmul.f32 -1.442695, %v713_v18 }
 0x695   :  { %2871 = vtanh.f32 %v713_v18 }
 0x696   :  { %2873 = vtanh.f32 %v604_v22  ;;  %v2250_v28 = vmul.f32 -1.442695, %v604_v22 }
 0x697   :  { %2875 = vpow2.f32 %v2252_v26 }
 0x698   :  { %2877 = vpow2.f32 %v2253_v27 }
 0x699   :  { %2879 = vpow2.f32 %v2250_v28 }
 0x69e   :  { %v2870_v23 = vpop.eup %2869 }
 0x69f   :  { %v2872_v24 = vpop.eup %2871  ;;  %738 = vrot.lane.b32.xlu1 %v2870_v23, %s3102_s1 }
 0x6a0   :  { %740 = vrot.lane.b32.xlu0 %v2872_v24, %s3102_s1  ;;  %v2874_v25 = vpop.eup %2873 }
 0x6a1   :  { %v2876_v29 = vpop.eup %2875 }
 0x6a2   :  { %v2878_v30 = vpop.eup %2877  ;;  %v720_v31 = vadd.f32 1.0, %v2876_v29 }
 0x6a3   :  { %616 = vrot.lane.b32.xlu1 %v2874_v25, %s3102_s1  ;;  %v721_v32 = vadd.f32 1.0, %v2878_v30  ;;  %v2880_v33 = vpop.eup %2879 }
 0x6a4   :  { %2881 = vrcp.f32 %v720_v31  ;;  %v610_v34 = vadd.f32 1.0, %v2880_v33 }
 0x6a5   :  { %2883 = vrcp.f32 %v721_v32 }
 0x6a6   :  { %2885 = vrcp.f32 %v610_v34 }
 0x6ae   :  { %v2882_v35 = vpop.eup %2881 }
 0x6af   :  { %v2884_v37 = vpop.eup %2883  ;;  %v734_v42 = vmul.f32 %v2882_v35, %v730_v50 }
 0x6b0   :  { %v2886_v44 = vpop.eup %2885  ;;  %v735_v53 = vmul.f32 %v2884_v37, %v731_v39 }
 0x6b1   :  { %v614_v59 = vmul.f32 %v2886_v44, %v3242_v51 }
 0x711   :  { %v739_v36 = vpop.permute.xlu1 %738 }
 0x712   :  { %v741_v38 = vpop.permute.xlu0 %740  ;;  %v744_v40 = vmul.f32 %v2882_v35, %v739_v36 }
 0x713   :  { %v745_v41 = vmul.f32 %v2884_v37, %v741_v38 }
 0x714   :  { %748 = vrot.lane.b32.xlu0 %v744_v40, %s3103_s6 }
 0x715   :  { %750 = vrot.lane.b32.xlu1 %v745_v41, %s3103_s6  ;;  %v617_v45 = vpop.permute.xlu1 %616 }
 0x716   :  { %v619_v49 = vmul.f32 %v2886_v44, %v617_v45 }
 0x718   :  { %621 = vrot.lane.b32.xlu0 %v619_v49, %s3103_s6 }
 0x786   :  { %v749_v54 = vpop.permute.xlu0 %748 }
 0x787   :  { %v751_v55 = vpop.permute.xlu1 %750  ;;  %v3282_v57 = vadd.f32 %v749_v54, %v734_v42 }
 0x788   :  { %v3284_v58 = vadd.f32 %v751_v55, %v735_v53 }
 0x789   :  { %2887 = vtanh.f32 %v3282_v57 }
 0x78a   :  { %2889 = vtanh.f32 %v3284_v58  ;;  %v622_v60 = vpop.permute.xlu0 %621 }
 0x78b   :  { %v3289_v61 = vadd.f32 %v622_v60, %v614_v59 }
 0x78d   :  { %2891 = vtanh.f32 %v3289_v61 }
 0x793   :  { %v2888_v43 = vpop.eup %2887 }
 0x794   :  { %v2890_v47 = vpop.eup %2889  ;;  %760 = vrot.lane.b32.xlu1 %v2888_v43, %s3102_s1  ;;  %v980_v43 = vrot.slane %v3282_v57, 7 }
 0x795   :  { %762 = vrot.lane.b32.xlu0 %v2890_v47, %s3102_s1  ;;  %v981_v47 = vrot.slane %v3284_v58, 7 }
 0x797   :  { %v2892_v62 = vpop.eup %2891 }
 0x798   :  { %627 = vrot.lane.b32.xlu1 %v2892_v62, %s3102_s1 }
 0x806   :  { %v761_v63 = vpop.permute.xlu1 %760 }
 0x807   :  { %v763_v2 = vpop.permute.xlu0 %762  ;;  %v766_v4 = vmul.f32 %v2882_v35, %v761_v63 }
 0x808   :  { %v767_v3 = vmul.f32 %v2884_v37, %v763_v2 }
 0x809   :  { %v880_v7 = vrot.slane %v766_v4, 2 }
 0x80a   :  { %v770_v51 = vrot.slane %v767_v3, 7  ;;  %v628_v5 = vpop.permute.xlu1 %627  ;;  %v881_v6 = vrot.slane %v767_v3, 1 }
 0x80b   :  { %v630_v9 = vmul.f32 %v2886_v44, %v628_v5 }
 0x80c   :  { %v772_v10 = vsel %vm771_vm9, %v770_v51, %v766_v4  ;;  %v882_v14 = vsel %vm283_vm5, %v881_v6, %v880_v7 }
 0x80d   :  { %773 = vrot.lane.b32.xlu0 %v772_v10, %s3103_s6  ;;  %v777_v13 = vrot.slane %v630_v9, 6 }
 0x80f   :  { %778 = vrot.lane.b32.xlu1 %v777_v13, %s3102_s1 }
 0x811   :  { %883 = vrot.lane.b32.xlu0 %v882_v14, %s3103_s6 }
 0x87f   :  { %v774_v15 = vpop.permute.xlu0 %773 }
 0x881   :  { %v779_v17 = vpop.permute.xlu1 %778 }
 0x882   :  { %v781_v18 = vsel %vm152_vm6, %v774_v15, %v779_v17 }
 0x883   :  { %v884_v19 = vpop.permute.xlu0 %883  ;;  %v783_v21 = vrot.slane %v781_v18, 2 }
 0x884   :  { %2510 = vmatmul.mubr.msk.f32.vlgmr.msra.gmra.mrb[6].mxu1 %vm152_vm6, %v884_v19 }
 0x885   :  { %2730 = vmatpush3.bf16.msra.mxu1 %v3184_v46  ;;  %2528 = vmatprep.mubr.msk.f32.mxu1 %vm3099_vm0, %v3100_v1 }
 0x886   :  { %2499 = vmatmul.mubr.msk.f32.vlgmr.msra.gmra.mrb[6].mxu0 %vm289_vm7, %v783_v21  ;;  %2731 = vmatprep.subr.bf16.mxu1 %v3098_v0 }
 0x887   :  { %2742 = vmatpush3.bf16.msra.mxu0 %v3148_v8  ;;  %2539 = vmatprep.mubr.msk.f32.mxu0 %vm3099_vm0, %v3100_v1 }
 0x888   :  { %2743 = vmatprep.subr.bf16.mxu0 %v3098_v0 }
 0x889   :  { %2733 = vmatpush3.bf16.msra.mxu1 %v3187_v48 }
 0x88a   :  { %2734 = vmatprep.subr.bf16.mxu1 %v3098_v0 }
 0x88b   :  { %2745 = vmatpush3.bf16.msra.mxu0 %v3152_v12 }
 0x88c   :  { %2746 = vmatprep.subr.bf16.mxu0 %v3098_v0 }
 0x88d   :  { %2736 = vmatpush3.bf16.msra.mxu1 %v3192_v52 }
 0x88e   :  { %2737 = vmatprep.subr.bf16.mxu1 %v3098_v0 }
 0x891   :  { %2739 = vmatpush3.bf16.msra.mxu1 %v3197_v56 }
 0x892   :  { %2758 = vmatprep.subr.bf16.mxu1 %v3098_v0 }
 0x957   :  { %v953_v22 = vpop.f32.mrb[6].mxu1 }
 0x958   :  { %v958_v23 = vrot.slane %v953_v22, 5  ;;  %v959_v24 = vrot.slane %v953_v22, 6  ;;  %v2511_v25 = vpop.f32.mrb[7].mxu1 }
 0x959   :  { %v852_v26 = vpop.f32.mrb[6].mxu0 }
 0x95a   :  { %v962_v27 = vadd.f32 %v958_v23, %v3170_v20  ;;  %v963_v28 = vadd.f32 %v959_v24, %v3168_v16  ;;  %v2500_v29 = vpop.f32.mrb[7].mxu0  ;;  %v853_v30 = vadd.f32 %v3225_v11, %v852_v26 }
 0x95c   :  { %2893 = vtanh.f32 %v962_v27  ;;  %v2257_v34 = vmul.f32 -1.442695, %v962_v27  ;;  %v2258_v35 = vmul.f32 -1.442695, %v963_v28  ;;  %v2255_v36 = vmul.f32 -1.442695, %v853_v30 }
 0x95d   :  { %2895 = vtanh.f32 %v963_v28 }
 0x95e   :  { %2897 = vtanh.f32 %v853_v30 }
 0x95f   :  { %2899 = vpow2.f32 %v2257_v34 }
 0x960   :  { %2901 = vpow2.f32 %v2258_v35 }
 0x961   :  { %2903 = vpow2.f32 %v2255_v36 }
 0x966   :  { %v2894_v31 = vpop.eup %2893 }
 0x967   :  { %v2896_v32 = vpop.eup %2895  ;;  %988 = vrot.lane.b32.xlu1 %v2894_v31, %s3102_s1 }
 0x968   :  { %990 = vrot.lane.b32.xlu0 %v2896_v32, %s3102_s1  ;;  %v2898_v33 = vpop.eup %2897 }
 0x969   :  { %v2900_v37 = vpop.eup %2899 }
 0x96a   :  { %v2902_v38 = vpop.eup %2901  ;;  %v970_v40 = vadd.f32 1.0, %v2900_v37 }
 0x96b   :  { %865 = vrot.lane.b32.xlu1 %v2898_v33, %s3102_s1  ;;  %v971_v41 = vadd.f32 1.0, %v2902_v38  ;;  %v2904_v44 = vpop.eup %2903 }
 0x96c   :  { %2905 = vrcp.f32 %v970_v40  ;;  %v859_v45 = vadd.f32 1.0, %v2904_v44 }
 0x96d   :  { %2907 = vrcp.f32 %v971_v41 }
 0x96e   :  { %2909 = vrcp.f32 %v859_v45 }
 0x976   :  { %v2906_v49 = vpop.eup %2905 }
 0x977   :  { %v2908_v39 = vpop.eup %2907  ;;  %v984_v62 = vmul.f32 %v2906_v49, %v980_v43 }
 0x978   :  { %v2910_v55 = vpop.eup %2909  ;;  %v985_v2 = vmul.f32 %v2908_v39, %v981_v47 }
 0x979   :  { %v863_v5 = vmul.f32 %v2910_v55, %v3289_v61 }
 0x9d9   :  { %v989_v50 = vpop.permute.xlu1 %988 }
 0x9da   :  { %v991_v42 = vpop.permute.xlu0 %990  ;;  %v994_v53 = vmul.f32 %v2906_v49, %v989_v50 }
 0x9db   :  { %v995_v54 = vmul.f32 %v2908_v39, %v991_v42 }
 0x9dc   :  { %998 = vrot.lane.b32.xlu0 %v994_v53, %s3103_s6 }
 0x9dd   :  { %1000 = vrot.lane.b32.xlu1 %v995_v54, %s3103_s6  ;;  %v866_v59 = vpop.permute.xlu1 %865 }
 0x9de   :  { %v868_v60 = vmul.f32 %v2910_v55, %v866_v59 }
 0x9e0   :  { %870 = vrot.lane.b32.xlu0 %v868_v60, %s3103_s6 }
 0xa4e   :  { %v999_v63 = vpop.permute.xlu0 %998 }
 0xa4f   :  { %v3329_v3 = vadd.f32 %v999_v63, %v984_v62  ;;  %v1001_v4 = vpop.permute.xlu1 %1000 }
 0xa50   :  { %v3331_v51 = vadd.f32 %v1001_v4, %v985_v2 }
 0xa51   :  { %2911 = vtanh.f32 %v3329_v3 }
 0xa52   :  { %2913 = vtanh.f32 %v3331_v51  ;;  %v871_v6 = vpop.permute.xlu0 %870 }
 0xa53   :  { %v3336_v7 = vadd.f32 %v871_v6, %v863_v5 }
 0xa55   :  { %2915 = vtanh.f32 %v3336_v7 }
 0xa5b   :  { %v2912_v57 = vpop.eup %2911 }
 0xa5c   :  { %v2914_v58 = vpop.eup %2913  ;;  %1010 = vrot.lane.b32.xlu1 %v2912_v57, %s3102_s1  ;;  %v1230_v57 = vrot.slane %v3329_v3, 7 }
 0xa5d   :  { %1012 = vrot.lane.b32.xlu0 %v2914_v58, %s3102_s1  ;;  %v1231_v58 = vrot.slane %v3331_v51, 7 }
 0xa5f   :  { %v2916_v9 = vpop.eup %2915 }
 0xa60   :  { %876 = vrot.lane.b32.xlu1 %v2916_v9, %s3102_s1 }
 0xace   :  { %v1011_v10 = vpop.permute.xlu1 %1010 }
 0xacf   :  { %v1013_v13 = vpop.permute.xlu0 %1012  ;;  %v1016_v14 = vmul.f32 %v2906_v49, %v1011_v10 }
 0xad0   :  { %v1017_v15 = vmul.f32 %v2908_v39, %v1013_v13 }
 0xad1   :  { %v1130_v18 = vrot.slane %v1016_v14, 3 }
 0xad2   :  { %v1020_v61 = vrot.slane %v1017_v15, 7  ;;  %v877_v17 = vpop.permute.xlu1 %876  ;;  %v1131_v19 = vrot.slane %v1017_v15, 2 }
 0xad3   :  { %v879_v21 = vmul.f32 %v2910_v55, %v877_v17 }
 0xad4   :  { %v1022_v22 = vsel %vm1021_vm10, %v1020_v61, %v1016_v14  ;;  %v1132_v24 = vsel %vm283_vm5, %v1131_v19, %v1130_v18 }
 0xad5   :  { %1023 = vrot.lane.b32.xlu0 %v1022_v22, %s3103_s6  ;;  %v1027_v23 = vrot.slane %v879_v21, 5 }
 0xad7   :  { %1028 = vrot.lane.b32.xlu1 %v1027_v23, %s3102_s1 }
 0xad9   :  { %1133 = vrot.lane.b32.xlu0 %v1132_v24, %s3103_s6 }
 0xb47   :  { %v1024_v25 = vpop.permute.xlu0 %1023 }
 0xb49   :  { %v1029_v26 = vpop.permute.xlu1 %1028 }
 0xb4a   :  { %v1031_v27 = vsel %vm152_vm6, %v1024_v25, %v1029_v26 }
 0xb4b   :  { %v1134_v28 = vpop.permute.xlu0 %1133  ;;  %v1033_v29 = vrot.slane %v1031_v27, 3 }
 0xb4c   :  { %2540 = vmatmul.mubr.msk.f32.vlgmr.msra.gmra.mrb[8].mxu0 %vm152_vm6, %v1134_v28 }
 0xb4d   :  { %2748 = vmatpush3.bf16.msra.mxu0 %v3184_v46  ;;  %2558 = vmatprep.mubr.msk.f32.mxu0 %vm3099_vm0, %v3100_v1 }
 0xb4e   :  { %2529 = vmatmul.mubr.msk.f32.vlgmr.msra.gmra.mrb[8].mxu1 %vm289_vm7, %v1033_v29  ;;  %2749 = vmatprep.subr.bf16.mxu0 %v3098_v0 }
 0xb4f   :  { %2760 = vmatpush3.bf16.msra.mxu1 %v3148_v8  ;;  %2569 = vmatprep.mubr.msk.f32.mxu1 %vm3099_vm0, %v3100_v1 }
 0xb50   :  { %2761 = vmatprep.subr.bf16.mxu1 %v3098_v0 }
 0xb51   :  { %2751 = vmatpush3.bf16.msra.mxu0 %v3187_v48 }
 0xb52   :  { %2752 = vmatprep.subr.bf16.mxu0 %v3098_v0 }
 0xb53   :  { %2763 = vmatpush3.bf16.msra.mxu1 %v3152_v12 }
 0xb54   :  { %2764 = vmatprep.subr.bf16.mxu1 %v3098_v0 }
 0xb55   :  { %2754 = vmatpush3.bf16.msra.mxu0 %v3192_v52 }
 0xb56   :  { %2755 = vmatprep.subr.bf16.mxu0 %v3098_v0 }
 0xb59   :  { %2757 = vmatpush3.bf16.msra.mxu0 %v3197_v56 }
 0xb5a   :  { %2776 = vmatprep.subr.bf16.mxu0 %v3098_v0 }
 0xc1f   :  { %v1203_v30 = vpop.f32.mrb[8].mxu0 }
 0xc20   :  { %v1208_v31 = vrot.slane %v1203_v30, 4  ;;  %v1209_v32 = vrot.slane %v1203_v30, 5  ;;  %v2541_v33 = vpop.f32.mrb[9].mxu0 }
 0xc21   :  { %v1102_v34 = vpop.f32.mrb[8].mxu1 }
 0xc22   :  { %v1212_v35 = vadd.f32 %v1208_v31, %v3170_v20  ;;  %v1213_v36 = vadd.f32 %v1209_v32, %v3168_v16  ;;  %v2530_v37 = vpop.f32.mrb[9].mxu1  ;;  %v1103_v38 = vadd.f32 %v3225_v11, %v1102_v34 }
 0xc24   :  { %2917 = vtanh.f32 %v1212_v35  ;;  %v2262_v45 = vmul.f32 -1.442695, %v1212_v35  ;;  %v2263_v49 = vmul.f32 -1.442695, %v1213_v36  ;;  %v2260_v50 = vmul.f32 -1.442695, %v1103_v38 }
 0xc25   :  { %2919 = vtanh.f32 %v1213_v36 }
 0xc26   :  { %2921 = vtanh.f32 %v1103_v38 }
 0xc27   :  { %2923 = vpow2.f32 %v2262_v45 }
 0xc28   :  { %2925 = vpow2.f32 %v2263_v49 }
 0xc29   :  { %2927 = vpow2.f32 %v2260_v50 }
 0xc2e   :  { %v2918_v40 = vpop.eup %2917 }
 0xc2f   :  { %v2920_v41 = vpop.eup %2919  ;;  %1238 = vrot.lane.b32.xlu1 %v2918_v40, %s3102_s1 }
 0xc30   :  { %1240 = vrot.lane.b32.xlu0 %v2920_v41, %s3102_s1  ;;  %v2922_v44 = vpop.eup %2921 }
 0xc31   :  { %v2924_v39 = vpop.eup %2923 }
 0xc32   :  { %v2926_v42 = vpop.eup %2925  ;;  %v1220_v53 = vadd.f32 1.0, %v2924_v39 }
 0xc33   :  { %1115 = vrot.lane.b32.xlu1 %v2922_v44, %s3102_s1  ;;  %v1221_v54 = vadd.f32 1.0, %v2926_v42  ;;  %v2928_v55 = vpop.eup %2927 }
 0xc34   :  { %2929 = vrcp.f32 %v1220_v53  ;;  %v1109_v59 = vadd.f32 1.0, %v2928_v55 }
 0xc35   :  { %2931 = vrcp.f32 %v1221_v54 }
 0xc36   :  { %2933 = vrcp.f32 %v1109_v59 }
 0xc3e   :  { %v2930_v60 = vpop.eup %2929 }
 0xc3f   :  { %v2932_v47 = vpop.eup %2931  ;;  %v1234_v9 = vmul.f32 %v2930_v60, %v1230_v57 }
 0xc40   :  { %v2934_v4 = vpop.eup %2933  ;;  %v1235_v10 = vmul.f32 %v2932_v47, %v1231_v58 }
 0xc41   :  { %v1113_v17 = vmul.f32 %v2934_v4, %v3336_v7 }
 0xca1   :  { %v1239_v43 = vpop.permute.xlu1 %1238 }
 0xca2   :  { %v1241_v62 = vpop.permute.xlu0 %1240  ;;  %v1244_v63 = vmul.f32 %v2930_v60, %v1239_v43 }
 0xca3   :  { %v1245_v2 = vmul.f32 %v2932_v47, %v1241_v62 }
 0xca4   :  { %1248 = vrot.lane.b32.xlu0 %v1244_v63, %s3103_s6 }
 0xca5   :  { %1250 = vrot.lane.b32.xlu1 %v1245_v2, %s3103_s6  ;;  %v1116_v5 = vpop.permute.xlu1 %1115 }
 0xca6   :  { %v1118_v6 = vmul.f32 %v2934_v4, %v1116_v5 }
 0xca8   :  { %1120 = vrot.lane.b32.xlu0 %v1118_v6, %s3103_s6 }
 0xd16   :  { %v1249_v13 = vpop.permute.xlu0 %1248 }
 0xd17   :  { %v1251_v14 = vpop.permute.xlu1 %1250  ;;  %v3376_v15 = vadd.f32 %v1249_v13, %v1234_v9 }
 0xd18   :  { %v3378_v61 = vadd.f32 %v1251_v14, %v1235_v10 }
 0xd19   :  { %2935 = vtanh.f32 %v3376_v15 }
 0xd1a   :  { %2937 = vtanh.f32 %v3378_v61  ;;  %v1121_v18 = vpop.permute.xlu0 %1120 }
 0xd1b   :  { %v3383_v19 = vadd.f32 %v1121_v18, %v1113_v17 }
 0xd1d   :  { %2939 = vtanh.f32 %v3383_v19 }
 0xd23   :  { %v2936_v3 = vpop.eup %2935 }
 0xd24   :  { %v2938_v51 = vpop.eup %2937  ;;  %1260 = vrot.lane.b32.xlu1 %v2936_v3, %s3102_s1  ;;  %v1480_v3 = vrot.slane %v3376_v15, 7 }
 0xd25   :  { %1262 = vrot.lane.b32.xlu0 %v2938_v51, %s3102_s1  ;;  %v1481_v51 = vrot.slane %v3378_v61, 7 }
 0xd27   :  { %v2940_v21 = vpop.eup %2939 }
 0xd28   :  { %1126 = vrot.lane.b32.xlu1 %v2940_v21, %s3102_s1 }
 0xd96   :  { %v1261_v22 = vpop.permute.xlu1 %1260 }
 0xd97   :  { %v1263_v23 = vpop.permute.xlu0 %1262  ;;  %v1266_v25 = vmul.f32 %v2930_v60, %v1261_v22 }
 0xd98   :  { %v1267_v24 = vmul.f32 %v2932_v47, %v1263_v23 }
 0xd99   :  { %v1380_v28 = vrot.slane %v1266_v25, 4 }
 0xd9a   :  { %v1270_v7 = vrot.slane %v1267_v24, 7  ;;  %v1127_v26 = vpop.permute.xlu1 %1126  ;;  %v1381_v27 = vrot.slane %v1267_v24, 3 }
 0xd9b   :  { %v1129_v29 = vmul.f32 %v2934_v4, %v1127_v26 }
 0xd9c   :  { %v1272_v30 = vsel %vm1271_vm11, %v1270_v7, %v1266_v25  ;;  %v1382_v32 = vsel %vm283_vm5, %v1381_v27, %v1380_v28 }
 0xd9d   :  { %1273 = vrot.lane.b32.xlu0 %v1272_v30, %s3103_s6  ;;  %v1277_v31 = vrot.slane %v1129_v29, 4 }
 0xd9f   :  { %1278 = vrot.lane.b32.xlu1 %v1277_v31, %s3102_s1 }
 0xda1   :  { %1383 = vrot.lane.b32.xlu0 %v1382_v32, %s3103_s6 }
 0xe0f   :  { %v1274_v33 = vpop.permute.xlu0 %1273 }
 0xe11   :  { %v1279_v34 = vpop.permute.xlu1 %1278 }
 0xe12   :  { %v1281_v35 = vsel %vm152_vm6, %v1274_v33, %v1279_v34 }
 0xe13   :  { %v1384_v36 = vpop.permute.xlu0 %1383  ;;  %v1283_v37 = vrot.slane %v1281_v35, 4 }
 0xe14   :  { %2570 = vmatmul.mubr.msk.f32.vlgmr.msra.gmra.mrb[10].mxu1 %vm152_vm6, %v1384_v36 }
 0xe15   :  { %2766 = vmatpush3.bf16.msra.mxu1 %v3184_v46  ;;  %2588 = vmatprep.mubr.msk.f32.mxu1 %vm3099_vm0, %v3100_v1 }
 0xe16   :  { %2559 = vmatmul.mubr.msk.f32.vlgmr.msra.gmra.mrb[10].mxu0 %vm289_vm7, %v1283_v37  ;;  %2767 = vmatprep.subr.bf16.mxu1 %v3098_v0 }
 0xe17   :  { %2778 = vmatpush3.bf16.msra.mxu0 %v3148_v8  ;;  %2599 = vmatprep.mubr.msk.f32.mxu0 %vm3099_vm0, %v3100_v1 }
 0xe18   :  { %2779 = vmatprep.subr.bf16.mxu0 %v3098_v0 }
 0xe19   :  { %2769 = vmatpush3.bf16.msra.mxu1 %v3187_v48 }
 0xe1a   :  { %2770 = vmatprep.subr.bf16.mxu1 %v3098_v0 }
 0xe1b   :  { %2781 = vmatpush3.bf16.msra.mxu0 %v3152_v12 }
 0xe1c   :  { %2782 = vmatprep.subr.bf16.mxu0 %v3098_v0 }
 0xe1d   :  { %2772 = vmatpush3.bf16.msra.mxu1 %v3192_v52 }
 0xe1e   :  { %2773 = vmatprep.subr.bf16.mxu1 %v3098_v0 }
 0xe21   :  { %2775 = vmatpush3.bf16.msra.mxu1 %v3197_v56 }
 0xe22   :  { %2794 = vmatprep.subr.bf16.mxu1 %v3098_v0 }
 0xee7   :  { %v1453_v38 = vpop.f32.mrb[10].mxu1 }
 0xee8   :  { %v1458_v40 = vrot.slane %v1453_v38, 3  ;;  %v1459_v41 = vrot.slane %v1453_v38, 4  ;;  %v2571_v44 = vpop.f32.mrb[11].mxu1 }
 0xee9   :  { %v1352_v45 = vpop.f32.mrb[10].mxu0 }
 0xeea   :  { %v1462_v49 = vadd.f32 %v1458_v40, %v3170_v20  ;;  %v1463_v50 = vadd.f32 %v1459_v41, %v3168_v16  ;;  %v2560_v39 = vpop.f32.mrb[11].mxu0  ;;  %v1353_v42 = vadd.f32 %v3225_v11, %v1352_v45 }
 0xeec   :  { %2941 = vtanh.f32 %v1462_v49  ;;  %v2267_v59 = vmul.f32 -1.442695, %v1462_v49  ;;  %v2268_v60 = vmul.f32 -1.442695, %v1463_v50  ;;  %v2265_v43 = vmul.f32 -1.442695, %v1353_v42 }
 0xeed   :  { %2943 = vtanh.f32 %v1463_v50 }
 0xeee   :  { %2945 = vtanh.f32 %v1353_v42 }
 0xeef   :  { %2947 = vpow2.f32 %v2267_v59 }
 0xef0   :  { %2949 = vpow2.f32 %v2268_v60 }
 0xef1   :  { %2951 = vpow2.f32 %v2265_v43 }
 0xef6   :  { %v2942_v53 = vpop.eup %2941 }
 0xef7   :  { %v2944_v54 = vpop.eup %2943  ;;  %1488 = vrot.lane.b32.xlu1 %v2942_v53, %s3102_s1 }
 0xef8   :  { %1490 = vrot.lane.b32.xlu0 %v2944_v54, %s3102_s1  ;;  %v2946_v55 = vpop.eup %2945 }
 0xef9   :  { %v2948_v47 = vpop.eup %2947 }
 0xefa   :  { %v2950_v62 = vpop.eup %2949  ;;  %v1470_v63 = vadd.f32 1.0, %v2948_v47 }
 0xefb   :  { %1365 = vrot.lane.b32.xlu1 %v2946_v55, %s3102_s1  ;;  %v1471_v2 = vadd.f32 1.0, %v2950_v62  ;;  %v2952_v4 = vpop.eup %2951 }
 0xefc   :  { %2953 = vrcp.f32 %v1470_v63  ;;  %v1359_v5 = vadd.f32 1.0, %v2952_v4 }
 0xefd   :  { %2955 = vrcp.f32 %v1471_v2 }
 0xefe   :  { %2957 = vrcp.f32 %v1359_v5 }
 0xf06   :  { %v2954_v6 = vpop.eup %2953 }
 0xf07   :  { %v2956_v58 = vpop.eup %2955  ;;  %v1484_v21 = vmul.f32 %v2954_v6, %v1480_v3 }
 0xf08   :  { %v2958_v14 = vpop.eup %2957  ;;  %v1485_v23 = vmul.f32 %v2956_v58, %v1481_v51 }
 0xf09   :  { %v1363_v26 = vmul.f32 %v2958_v14, %v3383_v19 }
 0xf69   :  { %v1489_v57 = vpop.permute.xlu1 %1488 }
 0xf6a   :  { %v1491_v9 = vpop.permute.xlu0 %1490  ;;  %v1494_v10 = vmul.f32 %v2954_v6, %v1489_v57 }
 0xf6b   :  { %v1495_v13 = vmul.f32 %v2956_v58, %v1491_v9 }
 0xf6c   :  { %1498 = vrot.lane.b32.xlu0 %v1494_v10, %s3103_s6 }
 0xf6d   :  { %1500 = vrot.lane.b32.xlu1 %v1495_v13, %s3103_s6  ;;  %v1366_v17 = vpop.permute.xlu1 %1365 }
 0xf6e   :  { %v1368_v18 = vmul.f32 %v2958_v14, %v1366_v17 }
 0xf70   :  { %1370 = vrot.lane.b32.xlu0 %v1368_v18, %s3103_s6 }
 0xfde   :  { %v1499_v22 = vpop.permute.xlu0 %1498 }
 0xfdf   :  { %v3423_v24 = vadd.f32 %v1499_v22, %v1484_v21  ;;  %v1501_v25 = vpop.permute.xlu1 %1500 }
 0xfe0   :  { %v3425_v7 = vadd.f32 %v1501_v25, %v1485_v23 }
 0xfe1   :  { %2959 = vtanh.f32 %v3423_v24 }
 0xfe2   :  { %2961 = vtanh.f32 %v3425_v7  ;;  %v1371_v27 = vpop.permute.xlu0 %1370  ;;  %v1731_v25 = vrot.slane %v3425_v7, 7 }
 0xfe3   :  { %v3430_v28 = vadd.f32 %v1371_v27, %v1363_v26 }
 0xfe5   :  { %2963 = vtanh.f32 %v3430_v28 }
 0xfeb   :  { %v2960_v15 = vpop.eup %2959 }
 0xfec   :  { %v2962_v61 = vpop.eup %2961  ;;  %1510 = vrot.lane.b32.xlu1 %v2960_v15, %s3102_s1  ;;  %v1730_v15 = vrot.slane %v3423_v24, 7 }
 0xfed   :  { %1512 = vrot.lane.b32.xlu0 %v2962_v61, %s3102_s1 }
 0xfef   :  { %v2964_v29 = vpop.eup %2963 }
 0xff0   :  { %1376 = vrot.lane.b32.xlu1 %v2964_v29, %s3102_s1 }
0x105e   :  { %v1511_v30 = vpop.permute.xlu1 %1510 }
0x105f   :  { %v1513_v31 = vpop.permute.xlu0 %1512  ;;  %v1516_v32 = vmul.f32 %v2954_v6, %v1511_v30 }
0x1060   :  { %v1517_v33 = vmul.f32 %v2956_v58, %v1513_v31 }
0x1061   :  { %v1630_v35 = vrot.slane %v1516_v32, 5 }
0x1062   :  { %v1520_v19 = vrot.slane %v1517_v33, 7  ;;  %v1377_v34 = vpop.permute.xlu1 %1376  ;;  %v1631_v36 = vrot.slane %v1517_v33, 4 }
0x1063   :  { %v1379_v37 = vmul.f32 %v2958_v14, %v1377_v34 }
0x1064   :  { %v1522_v38 = vsel %vm1521_vm12, %v1520_v19, %v1516_v32  ;;  %v1632_v41 = vsel %vm283_vm5, %v1631_v36, %v1630_v35 }
0x1065   :  { %1523 = vrot.lane.b32.xlu0 %v1522_v38, %s3103_s6  ;;  %v1527_v40 = vrot.slane %v1379_v37, 3 }
0x1067   :  { %1528 = vrot.lane.b32.xlu1 %v1527_v40, %s3102_s1 }
0x1069   :  { %1633 = vrot.lane.b32.xlu0 %v1632_v41, %s3103_s6 }
0x10d7   :  { %v1524_v44 = vpop.permute.xlu0 %1523 }
0x10d9   :  { %v1529_v45 = vpop.permute.xlu1 %1528 }
0x10da   :  { %v1531_v49 = vsel %vm152_vm6, %v1524_v44, %v1529_v45 }
0x10db   :  { %v1634_v50 = vpop.permute.xlu0 %1633  ;;  %v1533_v39 = vrot.slane %v1531_v49, 5 }
0x10dc   :  { %2600 = vmatmul.mubr.msk.f32.vlgmr.msra.gmra.mrb[12].mxu0 %vm152_vm6, %v1634_v50 }
0x10dd   :  { %2784 = vmatpush3.bf16.msra.mxu0 %v3184_v46  ;;  %2618 = vmatprep.mubr.msk.f32.mxu0 %vm3099_vm0, %v3100_v1 }
0x10de   :  { %2589 = vmatmul.mubr.msk.f32.vlgmr.msra.gmra.mrb[12].mxu1 %vm289_vm7, %v1533_v39  ;;  %2785 = vmatprep.subr.bf16.mxu0 %v3098_v0 }
0x10df   :  { %2796 = vmatpush3.bf16.msra.mxu1 %v3148_v8  ;;  %2629 = vmatprep.mubr.msk.f32.mxu1 %vm3099_vm0, %v3100_v1 }
0x10e0   :  { %2797 = vmatprep.subr.bf16.mxu1 %v3098_v0 }
0x10e1   :  { %2787 = vmatpush3.bf16.msra.mxu0 %v3187_v48 }
0x10e2   :  { %2788 = vmatprep.subr.bf16.mxu0 %v3098_v0 }
0x10e3   :  { %2799 = vmatpush3.bf16.msra.mxu1 %v3152_v12 }
0x10e4   :  { %2800 = vmatprep.subr.bf16.mxu1 %v3098_v0 }
0x10e5   :  { %2790 = vmatpush3.bf16.msra.mxu0 %v3192_v52 }
0x10e6   :  { %2791 = vmatprep.subr.bf16.mxu0 %v3098_v0 }
0x10e9   :  { %2793 = vmatpush3.bf16.msra.mxu0 %v3197_v56 }
0x10ea   :  { %2812 = vmatprep.subr.bf16.mxu0 %v3098_v0 }
0x11af   :  { %v1703_v8 = vpop.f32.mrb[12].mxu0 }
0x11b0   :  { %v1708_v42 = vrot.slane %v1703_v8, 2  ;;  %v1709_v53 = vrot.slane %v1703_v8, 3  ;;  %v2601_v54 = vpop.f32.mrb[13].mxu0 }
0x11b1   :  { %v1602_v55 = vpop.f32.mrb[12].mxu1 }
0x11b2   :  { %v1713_v59 = vadd.f32 %v1709_v53, %v3168_v16  ;;  %v2590_v60 = vpop.f32.mrb[13].mxu1  ;;  %v1712_v12 = vadd.f32 %v1708_v42, %v3170_v20  ;;  %v1603_v43 = vadd.f32 %v3225_v11, %v1602_v55 }
0x11b3   :  { %v3501_v60 = vld [vmem:[#allocation5 + $0x78] ss:$0 sm:$0xff] }
0x11b4   :  { %2965 = vtanh.f32 %v1713_v59  ;;  %v2273_v2 = vmul.f32 -1.442695, %v1713_v59  ;;  %v2272_v4 = vmul.f32 -1.442695, %v1712_v12  ;;  %v2270_v5 = vmul.f32 -1.442695, %v1603_v43 }
0x11b5   :  { %2967 = vtanh.f32 %v1712_v12 }
0x11b6   :  { %2969 = vtanh.f32 %v1603_v43 }
0x11b7   :  { %2971 = vpow2.f32 %v2273_v2 }
0x11b8   :  { %2973 = vpow2.f32 %v2272_v4 }
0x11b9   :  { %2975 = vpow2.f32 %v2270_v5 }
0x11be   :  { %v2966_v47 = vpop.eup %2965 }
0x11bf   :  { %1740 = vrot.lane.b32.xlu1 %v2966_v47, %s3102_s1  ;;  %v2968_v62 = vpop.eup %2967 }
0x11c0   :  { %v2970_v63 = vpop.eup %2969 }
0x11c1   :  { %1615 = vrot.lane.b32.xlu0 %v2970_v63, %s3102_s1  ;;  %v2972_v6 = vpop.eup %2971 }
0x11c2   :  { %v2974_v57 = vpop.eup %2973  ;;  %v1721_v11 = vadd.f32 1.0, %v2972_v6 }
0x11c3   :  { %1738 = vrot.lane.b32.xlu1 %v2968_v62, %s3102_s1  ;;  %v2976_v58 = vpop.eup %2975  ;;  %v1720_v9 = vadd.f32 1.0, %v2974_v57 }
0x11c4   :  { %2977 = vrcp.f32 %v1721_v11  ;;  %v1609_v10 = vadd.f32 1.0, %v2976_v58 }
0x11c5   :  { %2979 = vrcp.f32 %v1720_v9 }
0x11c6   :  { %2981 = vrcp.f32 %v1609_v10 }
0x11ce   :  { %v2978_v13 = vpop.eup %2977 }
0x11cf   :  { %v2980_v18 = vpop.eup %2979  ;;  %v1735_v26 = vmul.f32 %v2978_v13, %v1731_v25 }
0x11d0   :  { %v2982_v3 = vpop.eup %2981  ;;  %v1734_v30 = vmul.f32 %v2980_v18, %v1730_v15 }
0x11d1   :  { %v1613_v29 = vmul.f32 %v2982_v3, %v3430_v28 }
0x1231   :  { %v1741_v14 = vpop.permute.xlu1 %1740 }
0x1232   :  { %v1745_v17 = vmul.f32 %v2978_v13, %v1741_v14 }
0x1233   :  { %v1616_v51 = vpop.permute.xlu0 %1615 }
0x1234   :  { %1750 = vrot.lane.b32.xlu0 %v1745_v17, %s3103_s6  ;;  %v1618_v22 = vmul.f32 %v2982_v3, %v1616_v51 }
0x1235   :  { %v1739_v21 = vpop.permute.xlu1 %1738 }
0x1236   :  { %v1744_v23 = vmul.f32 %v2980_v18, %v1739_v21  ;;  %1620 = vrot.lane.b32.xlu1 %v1618_v22, %s3103_s6 }
0x1238   :  { %1748 = vrot.lane.b32.xlu0 %v1744_v23, %s3103_s6 }
0x12a6   :  { %v1751_v27 = vpop.permute.xlu0 %1750 }
0x12a7   :  { %v3470_v61 = vadd.f32 %v1751_v27, %v1735_v26 }
0x12a8   :  { %v1621_v31 = vpop.permute.xlu1 %1620 }
0x12a9   :  { %2983 = vtanh.f32 %v3470_v61  ;;  %v3474_v33 = vadd.f32 %v1621_v31, %v1613_v29  ;;  %v1981_v26 = vrot.slane %v3470_v61, 7 }
0x12aa   :  { %v1749_v32 = vpop.permute.xlu0 %1748 }
0x12ab   :  { %v3476_v19 = vadd.f32 %v1749_v32, %v1734_v30  ;;  %2985 = vtanh.f32 %v3474_v33 }
0x12ad   :  { %2987 = vtanh.f32 %v3476_v19  ;;  %v1980_v27 = vrot.slane %v3476_v19, 7 }
0x12b3   :  { %v2984_v7 = vpop.eup %2983 }
0x12b4   :  { %1762 = vrot.lane.b32.xlu1 %v2984_v7, %s3102_s1 }
0x12b5   :  { %v2986_v24 = vpop.eup %2985 }
0x12b6   :  { %1626 = vrot.lane.b32.xlu0 %v2986_v24, %s3102_s1 }
0x12b7   :  { %v2988_v34 = vpop.eup %2987 }
0x12b8   :  { %1760 = vrot.lane.b32.xlu1 %v2988_v34, %s3102_s1 }
0x1326   :  { %v1763_v28 = vpop.permute.xlu1 %1762 }
0x1327   :  { %v1767_v35 = vmul.f32 %v2978_v13, %v1763_v28 }
0x1328   :  { %v1627_v36 = vpop.permute.xlu0 %1626 }
0x1329   :  { %v1629_v37 = vmul.f32 %v2982_v3, %v1627_v36  ;;  %v1770_v40 = vrot.slane %v1767_v35, 7  ;;  %v1881_v50 = vrot.slane %v1767_v35, 5 }
0x132a   :  { %v1761_v38 = vpop.permute.xlu1 %1760 }
0x132b   :  { %v1766_v41 = vmul.f32 %v2980_v18, %v1761_v38  ;;  %v1777_v44 = vrot.slane %v1629_v37, 2 }
0x132d   :  { %v1880_v45 = vrot.slane %v1766_v41, 6  ;;  %v1772_v49 = vsel %vm1771_vm13, %v1770_v40, %v1766_v41  ;;  %1778 = vrot.lane.b32.xlu1 %v1777_v44, %s3102_s1 }
0x132e   :  { %1773 = vrot.lane.b32.xlu0 %v1772_v49, %s3103_s6 }
0x132f   :  { %v1882_v39 = vsel %vm283_vm5, %v1881_v50, %v1880_v45 }
0x1332   :  { %1883 = vrot.lane.b32.xlu0 %v1882_v39, %s3103_s6 }
0x139f   :  { %v1779_v8 = vpop.permute.xlu1 %1778 }
0x13a0   :  { %v1774_v42 = vpop.permute.xlu0 %1773 }
0x13a1   :  { %v1781_v53 = vsel %vm152_vm6, %v1774_v42, %v1779_v8 }
0x13a2   :  { %v1783_v54 = vrot.slane %v1781_v53, 6 }
0x13a4   :  { %v1884_v55 = vpop.permute.xlu0 %1883  ;;  %2619 = vmatmul.mubr.msk.f32.vlgmr.msra.gmra.mrb[14].mxu0 %vm289_vm7, %v1783_v54 }
0x13a5   :  { %2630 = vmatmul.mubr.msk.f32.vlgmr.msra.gmra.mrb[14].mxu1 %vm152_vm6, %v1884_v55  ;;  %2659 = vmatprep.mubr.msk.f32.mxu0 %vm3099_vm0, %v3100_v1 }
0x13a6   :  { %2802 = vmatpush3.bf16.msra.mxu1 %v3184_v46  ;;  %2648 = vmatprep.mubr.msk.f32.mxu1 %vm3099_vm0, %v3100_v1 }
0x13a7   :  { %2803 = vmatprep.subr.bf16.mxu1 %v3098_v0 }
0x13aa   :  { %2805 = vmatpush3.bf16.msra.mxu1 %v3187_v48 }
0x13ab   :  { %2806 = vmatprep.subr.bf16.mxu1 %v3098_v0 }
0x13ae   :  { %2808 = vmatpush3.bf16.msra.mxu1 %v3192_v52 }
0x13af   :  { %2809 = vmatprep.subr.bf16.mxu1 %v3098_v0 }
0x13b2   :  { %2811 = vmatpush3.bf16.msra.mxu1 %v3197_v56 }
0x1477   :  { %v1852_v59 = vpop.f32.mrb[14].mxu0 }
0x1478   :  { %v1853_v46 = vadd.f32 %v3501_v60, %v1852_v59  ;;  %v2620_v12 = vpop.f32.mrb[15].mxu0  ;;  %v1953_v43 = vpop.f32.mrb[14].mxu1 }
0x1479   :  { %v1958_v1 = vrot.slane %v1953_v43, 1  ;;  %v1959_v47 = vrot.slane %v1953_v43, 2  ;;  %v2631_v62 = vpop.f32.mrb[15].mxu1 }
0x147a   :  { %2989 = vtanh.f32 %v1853_v46  ;;  %v2275_v4 = vmul.f32 -1.442695, %v1853_v46 }
0x147b   :  { %v1962_v48 = vadd.f32 %v1958_v1, %v3170_v20  ;;  %v1963_v63 = vadd.f32 %v1959_v47, %v3168_v16 }
0x147d   :  { %2991 = vtanh.f32 %v1962_v48  ;;  %v2277_v5 = vmul.f32 -1.442695, %v1962_v48  ;;  %v2278_v6 = vmul.f32 -1.442695, %v1963_v63 }
0x147e   :  { %2993 = vtanh.f32 %v1963_v63 }
0x147f   :  { %2995 = vpow2.f32 %v2275_v4  ;;  %v2137_v4 = vld [vmem:[#allocation5 + $0x90] sm:$0xff] }
0x1480   :  { %2997 = vpow2.f32 %v2277_v5 }
0x1481   :  { %2999 = vpow2.f32 %v2278_v6  ;;  %v2138_v6 = vld [vmem:[#allocation5 + $0x98] sm:$0xff] }
0x1484   :  { %v2990_v52 = vpop.eup %2989 }
0x1485   :  { %1865 = vrot.lane.b32.xlu1 %v2990_v52, %s3102_s1 }
0x1487   :  { %v2992_v56 = vpop.eup %2991 }
0x1488   :  { %v2994_v2 = vpop.eup %2993 }
0x1489   :  { %1990 = vrot.lane.b32.xlu0 %v2994_v2, %s3102_s1  ;;  %1988 = vrot.lane.b32.xlu1 %v2992_v56, %s3102_s1  ;;  %v2996_v20 = vpop.eup %2995  ;;  %v2136_v2 = vld [vmem:[#allocation5 + $0x88] sm:$0xff] }
0x148a   :  { %v2998_v57 = vpop.eup %2997  ;;  %v1859_v16 = vadd.f32 1.0, %v2996_v20  ;;  %v2816_v20 = vpack.c.bf16 %v2138_v6, %v2137_v4 }
0x148b   :  { %v3000_v11 = vpop.eup %2999  ;;  %v1970_v58 = vadd.f32 1.0, %v2998_v57 }
0x148c   :  { %3001 = vrcp.f32 %v1859_v16  ;;  %v1971_v9 = vadd.f32 1.0, %v3000_v11 }
0x148d   :  { %3003 = vrcp.f32 %v1970_v58 }
0x148e   :  { %3005 = vrcp.f32 %v1971_v9  ;;  %v2281_v9 = vld [vmem:[#allocation5 + $0xa0] ss:$0 sm:$0xff] }
0x1496   :  { %v3002_v10 = vpop.eup %3001 }
0x1497   :  { %v3004_v17 = vpop.eup %3003  ;;  %v1863_v23 = vmul.f32 %v3002_v10, %v3474_v33 }
0x1498   :  { %v3006_v18 = vpop.eup %3005  ;;  %v1984_v30 = vmul.f32 %v3004_v17, %v1980_v27 }
0x1499   :  { %v1985_v29 = vmul.f32 %v3006_v18, %v1981_v26 }
0x14f7   :  { %v1866_v13 = vpop.permute.xlu1 %1865 }
0x14f8   :  { %v1868_v14 = vmul.f32 %v3002_v10, %v1866_v13 }
0x14fa   :  { %1870 = vrot.lane.b32.xlu0 %v1868_v14, %s3103_s6 }
0x14fb   :  { %v1991_v3 = vpop.permute.xlu0 %1990  ;;  %v1989_v51 = vpop.permute.xlu1 %1988 }
0x14fc   :  { %v1995_v21 = vmul.f32 %v3006_v18, %v1991_v3  ;;  %v1994_v22 = vmul.f32 %v3004_v17, %v1989_v51 }
0x14fe   :  { %2000 = vrot.lane.b32.xlu1 %v1995_v21, %s3103_s6  ;;  %1998 = vrot.lane.b32.xlu0 %v1994_v22, %s3103_s6 }
0x156c   :  { %v1871_v25 = vpop.permute.xlu0 %1870 }
0x156d   :  { %v1873_v15 = vadd.f32 %v1871_v25, %v1863_v23 }
0x156f   :  { %3007 = vtanh.f32 %v1873_v15 }
0x1570   :  { %v2001_v31 = vpop.permute.xlu1 %2000  ;;  %v1999_v32 = vpop.permute.xlu0 %1998 }
0x1571   :  { %v2005_v7 = vadd.f32 %v2001_v31, %v1985_v29  ;;  %v2004_v24 = vadd.f32 %v1999_v32, %v1984_v30 }
0x1573   :  { %3009 = vtanh.f32 %v2005_v7 }
0x1574   :  { %3011 = vtanh.f32 %v2004_v24 }
0x1579   :  { %v3008_v34 = vpop.eup %3007 }
0x157a   :  { %1876 = vrot.lane.b32.xlu1 %v3008_v34, %s3102_s1 }
0x157d   :  { %v3010_v28 = vpop.eup %3009 }
0x157e   :  { %v3012_v33 = vpop.eup %3011  ;;  %2012 = vrot.lane.b32.xlu0 %v3010_v28, %s3102_s1 }
0x157f   :  { %2010 = vrot.lane.b32.xlu1 %v3012_v33, %s3102_s1 }
0x15ec   :  { %v1877_v61 = vpop.permute.xlu1 %1876 }
0x15ed   :  { %v1879_v37 = vmul.f32 %v3002_v10, %v1877_v61 }
0x15ef   :  { %v2028_v41 = vrot.slane %v1879_v37, 1 }
0x15f0   :  { %v2013_v19 = vpop.permute.xlu0 %2012 }
0x15f1   :  { %v2017_v35 = vmul.f32 %v3006_v18, %v2013_v19  ;;  %v2011_v36 = vpop.permute.xlu1 %2010 }
0x15f2   :  { %v2016_v38 = vmul.f32 %v3004_v17, %v2011_v36 }
0x15f3   :  { %v2020_v40 = vrot.slane %v2017_v35, 7 }
0x15f4   :  { %2021 = vrot.lane.b32.xlu0 %v2016_v38, %s3103_s6 }
0x15f5   :  { %2023 = vrot.lane.b32.xlu1 %v2020_v40, %s3103_s6 }
0x15f8   :  { %2029 = vrot.lane.b32.xlu0 %v2028_v41, %s3102_s1 }
0x1666   :  { %v2022_v44 = vpop.permute.xlu0 %2021 }
0x1667   :  { %v2024_v45 = vpop.permute.xlu1 %2023 }
0x166a   :  { %v2030_v49 = vpop.permute.xlu0 %2029 }
0x166b   :  { %v2032_v50 = vsel %vm152_vm6, %v2022_v44, %v2030_v49  ;;  %v2033_v39 = vsel %vm152_vm6, %v2024_v45, %v2030_v49 }
0x166c   :  { %v2036_v8 = vrot.slane %v2032_v50, 7  ;;  %v2037_v42 = vrot.slane %v2033_v39, 7 }
0x166e   :  { %v2038_v53 = vsel %vm73_vm1, %v2036_v8, %v2037_v42 }
0x166f   :  { %2649 = vmatmul.mubr.msk.f32.vlgmr.msra.gmra.mrb[16].mxu1 %vm289_vm7, %v2038_v53 }
0x1742   :  { %v2107_v54 = vpop.f32.mrb[16].mxu1 }
0x1743   :  { %v2108_v55 = vadd.f32 %v3501_v60, %v2107_v54  ;;  %v2650_v59 = vpop.f32.mrb[17].mxu1  ;;  %v2135_v60 = vld [vmem:[#allocation5 + $0x80] sm:$0xff] }
0x1744   :  { %v2813_v5 = vpack.c.bf16 %v2136_v2, %v2135_v60 }
0x1745   :  { %3013 = vtanh.f32 %v2108_v55  ;;  %v2280_v12 = vmul.f32 -1.442695, %v2108_v55 }
0x1746   :  { %2814 = vmatpush3.bf16.msra.mxu0 %v2813_v5 }
0x1747   :  { %3015 = vpow2.f32 %v2280_v12  ;;  %2815 = vmatprep.subr.bf16.mxu0 %v3098_v0 }
0x174a   :  { %2817 = vmatpush3.bf16.msra.mxu0 %v2816_v20 }
0x174f   :  { %v3014_v46 = vpop.eup %3013 }
0x1750   :  { %2120 = vrot.lane.b32.xlu1 %v3014_v46, %s3102_s1 }
0x1751   :  { %v3016_v43 = vpop.eup %3015 }
0x1752   :  { %v2114_v1 = vadd.f32 1.0, %v3016_v43 }
0x1754   :  { %3017 = vrcp.f32 %v2114_v1 }
0x175e   :  { %v3018_v47 = vpop.eup %3017 }
0x175f   :  { %v2118_v63 = vmul.f32 %v3018_v47, %v1873_v15 }
0x17c2   :  { %v2121_v62 = vpop.permute.xlu1 %2120 }
0x17c3   :  { %v2123_v48 = vmul.f32 %v3018_v47, %v2121_v62 }
0x17c5   :  { %2125 = vrot.lane.b32.xlu0 %v2123_v48, %s3103_s6 }
0x1837   :  { %v2126_v52 = vpop.permute.xlu0 %2125 }
0x1838   :  { %v2128_v56 = vadd.f32 %v2126_v52, %v2118_v63 }
0x183a   :  { %3019 = vtanh.f32 %v2128_v56 }
0x1844   :  { %v3020_v57 = vpop.eup %3019 }
0x1845   :  { %2131 = vrot.lane.b32.xlu1 %v3020_v57, %s3102_s1 }
0x18b7   :  { %v2132_v16 = vpop.permute.xlu1 %2131 }
0x18b8   :  { %v2134_v11 = vmul.f32 %v3018_v47, %v2132_v16 }
0x18ba   :  { %2145 = vrot.lane.b32.xlu0 %v2134_v11, %s3103_s6 }
0x192c   :  { %v2146_v58 = vpop.permute.xlu0 %2145 }
0x192d   :  { %2660 = vmatmul.mubr.msk.f32.vlgmr.msra.gmra.mrb[16].mxu0 %vm152_vm6, %v2146_v58 }
0x1a00   :  { %v2215_v10 = vpop.f32.mrb[16].mxu0 }
0x1a01   :  { %v2216_v13 = vadd.f32 %v2281_v9, %v2215_v10  ;;  %v2661_v14 = vpop.f32.mrb[17].mxu0 }
0x1a03   :  { %2220 = vst.msk [vmem:[#allocation7] sm:$0x3] %vm2219_vm14, %v2216_v13 }
0x1a04   :  { %3077 = shalt.err (!%p3074_p6)
}
0x1a05   :  { %s3078_s12 = scalar_lea.hbm %s3546_s2, 32 }
0x1a06   :  { %p3079_p7 = scmp.ne.s32.totalorder %s3546_s2, %s3078_s12  ;;  %p3082_p8 = scmp.lt.u32.totalorder %s3078_s12, %s3546_s2 }
0x1a08   :  { %p3084_p9 = pnand %p3082_p8, %p3079_p7 }
0x1a0a   :  { %3087 = shalt.err (!%p3084_p9)
}
0x1a0b   :  { %2230 = dma.vmem_to_hbm [thread:$0]  %s2228_s8, 32, %s3546_s2, [#allocation4]  }
0x1a0c   :  { %3092 = dma.done.wait [#allocation4], 32  }
0x1a0d   :  { %3093 = vsyncadd [#allocation4], 4294967264 }
0x1a0e   :  { %2234 = vsyncpa [#allocation3], 1 }
0x1a0f   :  { %2235 = vsyncpa [#allocation6], 1 }
0x1a10   :  { %2236 = vsyncpa [#allocation4], 1 }

</bundles_post_ra>
